<compile_context>
chip_gen: v5e
topology: v5e:2x2
jax: 0.10.0
libtpu: 0.0.40
codegen_flags: <defaults>
</compile_context>

<pallas_src>
import jax
import jax.numpy as jnp
from jax import lax
from jax.experimental import pallas as pl
from jax.experimental.pallas import tpu as pltpu


_HALF_LOG_2PI = 0.9189385332046727  # 0.5 * log(2*pi)


def _round_up(x: int, m: int) -> int:
    return ((x + m - 1) // m) * m


def _recip(x):
    """Reciprocal via one EUP vrcp + one VPU Newton step (~1e-5 relative error).

    Cheaper than a full f32 divide (single EUP pass; the two Newton multiplies land in
    VPU slots, which have slack in this EUP-bound kernel).
    """
    r = pl.reciprocal(x, approx=True)
    return r * (2.0 - x * r)


def _lgamma_digamma(x, with_digamma=True):
    """lgamma(x) (and optionally digamma(x)) for x > 0.

    Shift-by-6 recurrence + Stirling / asymptotic series, sharing y, log(y), 1/y and
    the shift product between the two functions.  EUP cost per element:
      lgamma only      : 2 logs + 1 vrcp
      lgamma + digamma : 2 logs + 2 vrcp
    Note: prod = x(x+1)...(x+5) overflows float32 for x >~ 2.6e6; typical Dirichlet
    concentrations are far below that.
    """
    u = x * (x + 5.0)                       # x^2 + 5x
    prod = u * (u + 4.0) * (u + 6.0)        # x(x+1)(x+2)(x+3)(x+4)(x+5)
    y = x + 6.0
    logy = jnp.log(y)
    inv = _recip(y)
    inv2 = inv * inv

    # lgamma(x) = lgamma(x+6) - log(prod); Stirling series at y = x+6 >= 6.
    lg = ((y - 0.5) * logy - y + _HALF_LOG_2PI
          + inv * (1.0 / 12.0
                   - inv2 * (1.0 / 360.0
                             - inv2 * (1.0 / 1260.0 - inv2 * (1.0 / 1680.0))))
          - jnp.log(prod))
    if not with_digamma:
        return lg, None

    # digamma(x) = digamma(x+6) - sum_{i=0..5} 1/(x+i); the sum is prod'(x)/prod(x)
    # with prod'(x) = (3u^2 + 20u + 24)(2x+5) -> evaluated with a single reciprocal.
    n = ((3.0 * u + 20.0) * u + 24.0) * (2.0 * x + 5.0)
    dg = (logy - 0.5 * inv
          - inv2 * (1.0 / 12.0 - inv2 * (1.0 / 120.0 - inv2 * (1.0 / 252.0)))
          - n * _recip(prod))
    return lg, dg


def _make_weighted_kl_kernel(mode, batch_size, tiles_per_split, natural_layout):
    """Kernel over batch tiles.

    natural_layout=True : blocks arrive as (TB, K) and are transposed in-kernel to a
                          lane-dense (K, TB) layout.
    natural_layout=False: blocks already arrive as (K, TB) (fallback path).
    """

    def kernel(model_ref, target_ref, cw_ref, out_ref):
        c = pl.program_id(0)   # core split
        i = pl.program_id(1)   # tile within split (accumulation axis)

        # Zero this core's resident partial-sum block at the start of its batch sweep.
        @pl.when(i == 0)
        def _():
            out_ref[...] = jnp.zeros_like(out_ref)

        if natural_layout:
            # (TB, K) contiguous HBM block -> lane-dense (K, TB).  The XLU transpose
            # is cheap: the kernel is EUP-bound and the XLU has slack.
            mt = jnp.transpose(model_ref[...].astype(jnp.float32))   # (K, TB)
            tt = jnp.transpose(target_ref[...].astype(jnp.float32))  # (K, TB)
        else:
            mt = model_ref[...].astype(jnp.float32)                  # (K, TB)
            tt = target_ref[...].astype(jnp.float32)
        cw = cw_ref[...].astype(jnp.float32)                         # (K, 1)
        k_dim, tb = mt.shape

        # Lane mask for batch columns past the true batch (ragged last tile / padded
        # grid).  Out-of-range columns are sanitized to concentration 1.0 (keeps every
        # lane finite) and their contribution is forced to exactly zero below.
        start = (c * tiles_per_split + i) * tb
        col = lax.broadcasted_iota(jnp.int32, (1, tb), 1)
        valid = (col + start) < batch_size                           # (1, TB)
        mt = jnp.where(valid, mt, 1.0)
        tt = jnp.where(valid, tt, 1.0)

        # Per-sample weights: K * sum_k(t*cw) / sum_k(t).
        sum_t = jnp.sum(tt, axis=0, keepdims=True)                   # (1, TB)
        sum_m = jnp.sum(mt, axis=0, keepdims=True)                   # (1, TB)
        s_tc = jnp.sum(tt * cw, axis=0, keepdims=True)               # (1, TB)
        sample_weight = (float(k_dim) * s_tc) * _recip(sum_t)        # (1, TB)

        if mode == "forward":
            p, q, sum_p, sum_q = tt, mt, sum_t, sum_m
        else:  # 'reverse' (default): p = model, q = target
            p, q, sum_p, sum_q = mt, tt, sum_m, sum_t

        lg_p, dg_p = _lgamma_digamma(p, with_digamma=True)           # (K, TB)
        lg_q, _ = _lgamma_digamma(q, with_digamma=False)             # (K, TB)
        # Stack the two (1, TB) sums so their lgamma/digamma share one set of EUP
        # passes (a (2, TB) array occupies the same vregs as a (1, TB) one).
        sums = jnp.concatenate([sum_p, sum_q], axis=0)               # (2, TB)
        lg_s, dg_s = _lgamma_digamma(sums, with_digamma=True)
        lg_sp, lg_sq, dg_sp = lg_s[0:1], lg_s[1:2], dg_s[0:1]

        kl = (lg_sp - lg_sq
              + jnp.sum(lg_q - lg_p, axis=0, keepdims=True)
              + jnp.sum((p - q) * (dg_p - dg_sp), axis=0, keepdims=True))  # (1, TB)

        # Lane-wise accumulation into the resident output block.
        out_ref[...] += jnp.where(valid, kl * sample_weight, 0.0)

    return kernel


def _num_tensorcores() -> int:
    """Best-effort TensorCore count of the current chip (2 on v4/v5p/v7x, else 1)."""
    try:
        dev = jax.devices()[0]
    except Exception:
        return 1
    n = getattr(dev, "num_cores", None)
    if isinstance(n, int) and n > 0:
        return min(int(n), 2)
    kind = str(getattr(dev, "device_kind", "")).lower()
    if any(tag in kind for tag in ("v7", "v4", "v5p", "v5 p")):
        return 2
    return 1


def _vmem_limit_bytes() -> int:
    """Scoped-VMEM limit for the kernel, derived from the chip's physical VMEM."""
    cap = 64 << 20  # conservative fallback (v7x physical VMEM per TensorCore)
    try:
        c = getattr(pltpu.get_tpu_info(), "vmem_capacity_bytes", None)
        if c:
            cap = int(c)
    except Exception:
        pass
    return min(int(cap * 0.85), 112 << 20)


def weighted_kl_loss(model_concentrations, target_concentrations, class_weights,
                     mode: str = "reverse"):
    """Pallas-backed equivalent of WeightedKlLoss.forward.  Returns a scalar f32."""
    model = jnp.asarray(model_concentrations)
    target = jnp.asarray(target_concentrations)
    assert model.shape == target.shape and model.ndim == 2
    b, k = model.shape
    cw = jnp.asarray(class_weights).reshape(k, 1).astype(jnp.float32)

    # --- tile-size heuristic -------------------------------------------------------
    vmem_limit = _vmem_limit_bytes()
    itemsize = jnp.dtype(model.dtype).itemsize
    lane_pad = _round_up(max(k, 128), 128)
    # Per batch column: 2 inputs x 2 pipeline buffers of the lane-padded (TB, K) block
    # + ~24 live (K, TB) f32 elementwise intermediates after the in-kernel transpose.
    per_col = 4 * lane_pad * itemsize + 24 * k * 4
    budget = min(vmem_limit // 2, 48 << 20)
    tb_cap = max(256, min(8192, (budget // per_col) // 256 * 256))

    # --- core split + batch tiling -------------------------------------------------
    nsplit = _num_tensorcores()
    if b < nsplit * 1024:          # not worth splitting tiny batches across cores
        nsplit = 1

    def _cover(ns):
        per_split = pl.cdiv(b, ns)
        if ns == 1 and per_split <= tb_cap:
            return per_split, 1                       # single full-batch block
        tiles = pl.cdiv(per_split, tb_cap)
        t = min(_round_up(pl.cdiv(per_split, tiles), 128), tb_cap)
        return t, tiles

    tb, tiles_per_split = _cover(nsplit)
    if (nsplit * tiles_per_split - 1) * tb >= b:
        # A block would start entirely past the real batch -> safe 1-core tiling.
        nsplit = 1
        if b <= tb_cap:
            tb, tiles_per_split = b, 1
        else:
            tb, tiles_per_split = tb_cap, pl.cdiv(b, tb_cap)

    out_shape = jax.ShapeDtypeStruct((1, nsplit * tb), jnp.float32)
    out_spec = pl.BlockSpec((1, tb), lambda c, i: (0, c))

    def _run(natural_layout, dim_sems):
        if natural_layout:
            # Natural (B, K) layout: contiguous blocks, no wrapper transpose/pad.
            args = (model, target, cw)
            in_specs = [
                pl.BlockSpec((tb, k), lambda c, i: (c * tiles_per_split + i, 0)),
                pl.BlockSpec((tb, k), lambda c, i: (c * tiles_per_split + i, 0)),
                pl.BlockSpec((k, 1), lambda c, i: (0, 0)),
            ]
        else:
            # Fallback: pre-transposed (K, B) layout padded with concentration 1.0
            # (padded columns are additionally masked to zero inside the kernel).
            b_pad = nsplit * tiles_per_split * tb

            def _prep(x):
                xt = x.T
                if b_pad > b:
                    xt = jnp.concatenate(
                        [xt, jnp.ones((k, b_pad - b), xt.dtype)], axis=1)
                return xt

            args = (_prep(model), _prep(target), cw)
            in_specs = [
                pl.BlockSpec((k, tb), lambda c, i: (0, c * tiles_per_split + i)),
                pl.BlockSpec((k, tb), lambda c, i: (0, c * tiles_per_split + i)),
                pl.BlockSpec((k, 1), lambda c, i: (0, 0)),
            ]
        return pl.pallas_call(
            _make_weighted_kl_kernel(mode, b, tiles_per_split, natural_layout),
            out_shape=out_shape,
            grid_spec=pltpu.PrefetchScalarGridSpec(
                num_scalar_prefetch=0,
                grid=(nsplit, tiles_per_split),
                in_specs=in_specs,
                out_specs=out_spec,
            ),
            compiler_params=pltpu.CompilerParams(
                dimension_semantics=dim_sems,
                vmem_limit_bytes=vmem_limit),
        )(*args)

    plain_sems = ("parallel", "arbitrary")
    if nsplit > 1:
        pref_sems = (getattr(pltpu, "CORE_PARALLEL", "parallel"),
                     getattr(pltpu, "ARBITRARY", "arbitrary"))
    else:
        pref_sems = plain_sems

    # Preference order: natural layout + explicit core split, then natural layout with
    # classic semantics, then the pre-transposed fallback layout.  (The wrapper is
    # called eagerly, so Mosaic lowering errors are catchable here.)
    attempts = ((True, pref_sems), (True, plain_sems), (False, plain_sems))
    partial = None
    last_err = None
    for natural_layout, dim_sems in attempts:
        try:
            partial = _run(natural_layout, dim_sems)
            break
        except Exception as e:  # lowering / compile fallback
            last_err = e
    if partial is None:
        raise last_err

    # Final cross-lane / cross-core reduction and mean over the true batch size.
    return jnp.sum(partial) / float(b)


def _reference_loss(model, target, class_weights, mode="reverse"):
    """Pure-JAX reference mirroring the PyTorch module (for the self-check)."""
    from jax.scipy.special import gammaln, digamma

    mean_t = target.mean(axis=1)
    weight = (target / mean_t[:, None]) * class_weights
    sample_weight = weight.sum(axis=1)
    if mode == "forward":
        p, q = target, model
    else:
        p, q = model, target
    sum_p = p.sum(axis=1)
    sum_q = q.sum(axis=1)
    kl = (gammaln(sum_p) - gammaln(sum_q)
          + (gammaln(q) - gammaln(p)).sum(axis=1)
          + ((p - q) * (digamma(p) - digamma(sum_p)[:, None])).sum(axis=1))
    return jnp.mean(kl * sample_weight)


if __name__ == "__main__":
    # TODO(synk): the module's runtime asserts (concentrations > 0, assert_no_nan_no_inf)
    # have no in-kernel equivalent; they are checked host-side on the result below.
    B, K = 8, 16  # batch, Dirichlet dimension (num classes)
    key = jax.random.PRNGKey(0)
    k1, k2, k3 = jax.random.split(key, 3)

    # concentrations must be strictly positive
    model_conc = jax.random.uniform(k1, (B, K), jnp.float32, minval=0.5, maxval=5.0)
    target_conc = jax.random.uniform(k2, (B, K), jnp.float32, minval=0.5, maxval=5.0)
    # deterministic synthetic class_weights (module's __init__ takes them as input)
    class_weights = jax.random.uniform(k3, (K,), jnp.float32, minval=0.5, maxval=2.0)

    loss = weighted_kl_loss(model_conc, target_conc, class_weights, mode="reverse")
    loss = jax.block_until_ready(loss)

    ref = _reference_loss(model_conc, target_conc, class_weights, mode="reverse")

    # mirrors assert_no_nan_no_inf + checks the in-kernel lgamma/digamma series
    assert bool(jnp.isfinite(loss)), "loss is NaN/Inf"
    assert bool(jnp.allclose(loss, ref, rtol=1e-3, atol=1e-3)), (float(loss), float(ref))

    print("KERNEL_OK")
</pallas_src>

<mosaic_0001>
module attributes {stable_mosaic.version = 11 : i64} {
  func.func @kernel(%arg0: i32, %arg1: i32, %arg2: memref<8x16xf32, #tpu.memory_space<vmem>>, %arg3: memref<8x16xf32, #tpu.memory_space<vmem>>, %arg4: memref<16x1xf32, #tpu.memory_space<vmem>>, %arg5: memref<1x8xf32, #tpu.memory_space<vmem>>) attributes {dimension_semantics = [#tpu.dimension_semantics<parallel>, #tpu.dimension_semantics<arbitrary>], iteration_bounds = array<i64: 1, 1>, scalar_prefetch = 0 : i64, scratch_operands = 0 : i64, tpu.core_type = #tpu.core_type<tc>, window_params = [{transform_indices = @transform_0, window_bounds = array<i64: 8, 16>}, {transform_indices = @transform_1, window_bounds = array<i64: 8, 16>}, {pipeline_mode = #tpu.pipeline_mode<synchronous>, transform_indices = @transform_2, window_bounds = array<i64: 16, 1>}, {transform_indices = @transform_3, window_bounds = array<i64: 1, 8>}]} {
    %c0_i32 = arith.constant 0 : i32
    %0 = arith.cmpi eq, %arg1, %c0_i32 : i32
    %1 = arith.extui %0 : i1 to i32
    %c0_i32_0 = arith.constant 0 : i32
    %2 = arith.cmpi ne, %1, %c0_i32_0 : i32
    scf.if %2 {
      %cst_73 = arith.constant 0.000000e+00 : f32
      %238 = vector.broadcast %cst_73 : f32 to vector<1x8xf32>
      %c0_74 = arith.constant 0 : index
      %c0_75 = arith.constant 0 : index
      %239 = vector.load %arg5[%c0_74, %c0_75] : memref<1x8xf32, #tpu.memory_space<vmem>>, vector<1x8xf32>
      tpu.vector_store %arg5[%c0_74, %c0_75], %238 {strides = array<i32>} : memref<1x8xf32, #tpu.memory_space<vmem>>, vector<1x8xf32>,
    } else {
    }
    %c0 = arith.constant 0 : index
    %c0_1 = arith.constant 0 : index
    %3 = vector.load %arg2[%c0, %c0_1] : memref<8x16xf32, #tpu.memory_space<vmem>>, vector<8x16xf32>
    %4 = tpu.transpose %3, [1, 0] : vector<8x16xf32> -> vector<16x8xf32>
    %c0_2 = arith.constant 0 : index
    %c0_3 = arith.constant 0 : index
    %5 = vector.load %arg3[%c0_2, %c0_3] : memref<8x16xf32, #tpu.memory_space<vmem>>, vector<8x16xf32>
    %6 = tpu.transpose %5, [1, 0] : vector<8x16xf32> -> vector<16x8xf32>
    %c0_4 = arith.constant 0 : index
    %c0_5 = arith.constant 0 : index
    %7 = vector.load %arg4[%c0_4, %c0_5] : memref<16x1xf32, #tpu.memory_space<vmem>>, vector<16x1xf32>
    %c1_i32 = arith.constant 1 : i32
    %8 = arith.muli %arg0, %c1_i32 : i32
    %9 = arith.addi %8, %arg1 : i32
    %c8_i32 = arith.constant 8 : i32
    %10 = arith.muli %9, %c8_i32 : i32
    %11 = tpu.iota {dimensions = array<i32: 1>} : vector<1x8xi32>
    %12 = vector.broadcast %10 : i32 to vector<1x8xi32>
    %13 = arith.addi %11, %12 : vector<1x8xi32>
    %c8_i32_6 = arith.constant 8 : i32
    %14 = vector.broadcast %c8_i32_6 : i32 to vector<1x8xi32>
    %15 = arith.cmpi slt, %13, %14 : vector<1x8xi32>
    %cst = arith.constant 1.000000e+00 : f32
    %16 = vector.shape_cast %15 : vector<1x8xi1> to vector<1x8xi1>
    %17 = vector.broadcast %16 : vector<1x8xi1> to vector<16x8xi1>
    %18 = vector.broadcast %cst : f32 to vector<16x8xf32>
    %19 = arith.select %17, %4, %18 : vector<16x8xi1>, vector<16x8xf32>
    %cst_7 = arith.constant 1.000000e+00 : f32
    %20 = vector.shape_cast %15 : vector<1x8xi1> to vector<1x8xi1>
    %21 = vector.broadcast %20 : vector<1x8xi1> to vector<16x8xi1>
    %22 = vector.broadcast %cst_7 : f32 to vector<16x8xf32>
    %23 = arith.select %21, %6, %22 : vector<16x8xi1>, vector<16x8xf32>
    %cst_8 = arith.constant dense<0.000000e+00> : vector<8xf32>
    %24 = vector.multi_reduction <add>, %23, %cst_8 [0] : vector<16x8xf32> to vector<8xf32>
    %25 = vector.shape_cast %24 : vector<8xf32> to vector<1x8xf32>
    %cst_9 = arith.constant dense<0.000000e+00> : vector<8xf32>
    %26 = vector.multi_reduction <add>, %19, %cst_9 [0] : vector<16x8xf32> to vector<8xf32>
    %27 = vector.shape_cast %26 : vector<8xf32> to vector<1x8xf32>
    %28 = vector.broadcast %7 : vector<16x1xf32> to vector<16x8xf32>
    %29 = arith.mulf %23, %28 : vector<16x8xf32>
    %cst_10 = arith.constant dense<0.000000e+00> : vector<8xf32>
    %30 = vector.multi_reduction <add>, %29, %cst_10 [0] : vector<16x8xf32> to vector<8xf32>
    %31 = vector.shape_cast %30 : vector<8xf32> to vector<1x8xf32>
    %cst_11 = arith.constant 1.600000e+01 : f32
    %32 = vector.broadcast %cst_11 : f32 to vector<1x8xf32>
    %33 = arith.mulf %32, %31 : vector<1x8xf32>
    %34 = tpu.reciprocal %25 {approx = true} : vector<1x8xf32> -> vector<1x8xf32>
    %35 = arith.mulf %25, %34 : vector<1x8xf32>
    %cst_12 = arith.constant 2.000000e+00 : f32
    %36 = vector.broadcast %cst_12 : f32 to vector<1x8xf32>
    %37 = arith.subf %36, %35 : vector<1x8xf32>
    %38 = arith.mulf %34, %37 : vector<1x8xf32>
    %39 = arith.mulf %33, %38 : vector<1x8xf32>
    %cst_13 = arith.constant 5.000000e+00 : f32
    %40 = vector.broadcast %cst_13 : f32 to vector<16x8xf32>
    %41 = arith.addf %19, %40 : vector<16x8xf32>
    %42 = arith.mulf %19, %41 : vector<16x8xf32>
    %cst_14 = arith.constant 4.000000e+00 : f32
    %43 = vector.broadcast %cst_14 : f32 to vector<16x8xf32>
    %44 = arith.addf %42, %43 : vector<16x8xf32>
    %45 = arith.mulf %42, %44 : vector<16x8xf32>
    %cst_15 = arith.constant 6.000000e+00 : f32
    %46 = vector.broadcast %cst_15 : f32 to vector<16x8xf32>
    %47 = arith.addf %42, %46 : vector<16x8xf32>
    %48 = arith.mulf %45, %47 : vector<16x8xf32>
    %cst_16 = arith.constant 6.000000e+00 : f32
    %49 = vector.broadcast %cst_16 : f32 to vector<16x8xf32>
    %50 = arith.addf %19, %49 : vector<16x8xf32>
    %51 = math.log %50 : vector<16x8xf32>
    %52 = tpu.reciprocal %50 {approx = true} : vector<16x8xf32> -> vector<16x8xf32>
    %53 = arith.mulf %50, %52 : vector<16x8xf32>
    %cst_17 = arith.constant 2.000000e+00 : f32
    %54 = vector.broadcast %cst_17 : f32 to vector<16x8xf32>
    %55 = arith.subf %54, %53 : vector<16x8xf32>
    %56 = arith.mulf %52, %55 : vector<16x8xf32>
    %57 = arith.mulf %56, %56 : vector<16x8xf32>
    %cst_18 = arith.constant 5.000000e-01 : f32
    %58 = vector.broadcast %cst_18 : f32 to vector<16x8xf32>
    %59 = arith.subf %50, %58 : vector<16x8xf32>
    %60 = arith.mulf %59, %51 : vector<16x8xf32>
    %61 = arith.subf %60, %50 : vector<16x8xf32>
    %cst_19 = arith.constant 0.918938517 : f32
    %62 = vector.broadcast %cst_19 : f32 to vector<16x8xf32>
    %63 = arith.addf %61, %62 : vector<16x8xf32>
    %cst_20 = arith.constant 5.95238118E-4 : f32
    %64 = vector.broadcast %cst_20 : f32 to vector<16x8xf32>
    %65 = arith.mulf %57, %64 : vector<16x8xf32>
    %cst_21 = arith.constant 7.93650805E-4 : f32
    %66 = vector.broadcast %cst_21 : f32 to vector<16x8xf32>
    %67 = arith.subf %66, %65 : vector<16x8xf32>
    %68 = arith.mulf %57, %67 : vector<16x8xf32>
    %cst_22 = arith.constant 0.00277777785 : f32
    %69 = vector.broadcast %cst_22 : f32 to vector<16x8xf32>
    %70 = arith.subf %69, %68 : vector<16x8xf32>
    %71 = arith.mulf %57, %70 : vector<16x8xf32>
    %cst_23 = arith.constant 0.0833333358 : f32
    %72 = vector.broadcast %cst_23 : f32 to vector<16x8xf32>
    %73 = arith.subf %72, %71 : vector<16x8xf32>
    %74 = arith.mulf %56, %73 : vector<16x8xf32>
    %75 = arith.addf %63, %74 : vector<16x8xf32>
    %76 = math.log %48 : vector<16x8xf32>
    %77 = arith.subf %75, %76 : vector<16x8xf32>
    %cst_24 = arith.constant 3.000000e+00 : f32
    %78 = vector.broadcast %cst_24 : f32 to vector<16x8xf32>
    %79 = arith.mulf %78, %42 : vector<16x8xf32>
    %cst_25 = arith.constant 2.000000e+01 : f32
    %80 = vector.broadcast %cst_25 : f32 to vector<16x8xf32>
    %81 = arith.addf %79, %80 : vector<16x8xf32>
    %82 = arith.mulf %81, %42 : vector<16x8xf32>
    %cst_26 = arith.constant 2.400000e+01 : f32
    %83 = vector.broadcast %cst_26 : f32 to vector<16x8xf32>
    %84 = arith.addf %82, %83 : vector<16x8xf32>
    %cst_27 = arith.constant 2.000000e+00 : f32
    %85 = vector.broadcast %cst_27 : f32 to vector<16x8xf32>
    %86 = arith.mulf %85, %19 : vector<16x8xf32>
    %cst_28 = arith.constant 5.000000e+00 : f32
    %87 = vector.broadcast %cst_28 : f32 to vector<16x8xf32>
    %88 = arith.addf %86, %87 : vector<16x8xf32>
    %89 = arith.mulf %84, %88 : vector<16x8xf32>
    %cst_29 = arith.constant 5.000000e-01 : f32
    %90 = vector.broadcast %cst_29 : f32 to vector<16x8xf32>
    %91 = arith.mulf %90, %56 : vector<16x8xf32>
    %92 = arith.subf %51, %91 : vector<16x8xf32>
    %cst_30 = arith.constant 0.0039682542 : f32
    %93 = vector.broadcast %cst_30 : f32 to vector<16x8xf32>
    %94 = arith.mulf %57, %93 : vector<16x8xf32>
    %cst_31 = arith.constant 0.00833333377 : f32
    %95 = vector.broadcast %cst_31 : f32 to vector<16x8xf32>
    %96 = arith.subf %95, %94 : vector<16x8xf32>
    %97 = arith.mulf %57, %96 : vector<16x8xf32>
    %cst_32 = arith.constant 0.0833333358 : f32
    %98 = vector.broadcast %cst_32 : f32 to vector<16x8xf32>
    %99 = arith.subf %98, %97 : vector<16x8xf32>
    %100 = arith.mulf %57, %99 : vector<16x8xf32>
    %101 = arith.subf %92, %100 : vector<16x8xf32>
    %102 = tpu.reciprocal %48 {approx = true} : vector<16x8xf32> -> vector<16x8xf32>
    %103 = arith.mulf %48, %102 : vector<16x8xf32>
    %cst_33 = arith.constant 2.000000e+00 : f32
    %104 = vector.broadcast %cst_33 : f32 to vector<16x8xf32>
    %105 = arith.subf %104, %103 : vector<16x8xf32>
    %106 = arith.mulf %102, %105 : vector<16x8xf32>
    %107 = arith.mulf %89, %106 : vector<16x8xf32>
    %108 = arith.subf %101, %107 : vector<16x8xf32>
    %cst_34 = arith.constant 5.000000e+00 : f32
    %109 = vector.broadcast %cst_34 : f32 to vector<16x8xf32>
    %110 = arith.addf %23, %109 : vector<16x8xf32>
    %111 = arith.mulf %23, %110 : vector<16x8xf32>
    %cst_35 = arith.constant 4.000000e+00 : f32
    %112 = vector.broadcast %cst_35 : f32 to vector<16x8xf32>
    %113 = arith.addf %111, %112 : vector<16x8xf32>
    %114 = arith.mulf %111, %113 : vector<16x8xf32>
    %cst_36 = arith.constant 6.000000e+00 : f32
    %115 = vector.broadcast %cst_36 : f32 to vector<16x8xf32>
    %116 = arith.addf %111, %115 : vector<16x8xf32>
    %117 = arith.mulf %114, %116 : vector<16x8xf32>
    %cst_37 = arith.constant 6.000000e+00 : f32
    %118 = vector.broadcast %cst_37 : f32 to vector<16x8xf32>
    %119 = arith.addf %23, %118 : vector<16x8xf32>
    %120 = math.log %119 : vector<16x8xf32>
    %121 = tpu.reciprocal %119 {approx = true} : vector<16x8xf32> -> vector<16x8xf32>
    %122 = arith.mulf %119, %121 : vector<16x8xf32>
    %cst_38 = arith.constant 2.000000e+00 : f32
    %123 = vector.broadcast %cst_38 : f32 to vector<16x8xf32>
    %124 = arith.subf %123, %122 : vector<16x8xf32>
    %125 = arith.mulf %121, %124 : vector<16x8xf32>
    %126 = arith.mulf %125, %125 : vector<16x8xf32>
    %cst_39 = arith.constant 5.000000e-01 : f32
    %127 = vector.broadcast %cst_39 : f32 to vector<16x8xf32>
    %128 = arith.subf %119, %127 : vector<16x8xf32>
    %129 = arith.mulf %128, %120 : vector<16x8xf32>
    %130 = arith.subf %129, %119 : vector<16x8xf32>
    %cst_40 = arith.constant 0.918938517 : f32
    %131 = vector.broadcast %cst_40 : f32 to vector<16x8xf32>
    %132 = arith.addf %130, %131 : vector<16x8xf32>
    %cst_41 = arith.constant 5.95238118E-4 : f32
    %133 = vector.broadcast %cst_41 : f32 to vector<16x8xf32>
    %134 = arith.mulf %126, %133 : vector<16x8xf32>
    %cst_42 = arith.constant 7.93650805E-4 : f32
    %135 = vector.broadcast %cst_42 : f32 to vector<16x8xf32>
    %136 = arith.subf %135, %134 : vector<16x8xf32>
    %137 = arith.mulf %126, %136 : vector<16x8xf32>
    %cst_43 = arith.constant 0.00277777785 : f32
    %138 = vector.broadcast %cst_43 : f32 to vector<16x8xf32>
    %139 = arith.subf %138, %137 : vector<16x8xf32>
    %140 = arith.mulf %126, %139 : vector<16x8xf32>
    %cst_44 = arith.constant 0.0833333358 : f32
    %141 = vector.broadcast %cst_44 : f32 to vector<16x8xf32>
    %142 = arith.subf %141, %140 : vector<16x8xf32>
    %143 = arith.mulf %125, %142 : vector<16x8xf32>
    %144 = arith.addf %132, %143 : vector<16x8xf32>
    %145 = math.log %117 : vector<16x8xf32>
    %146 = arith.subf %144, %145 : vector<16x8xf32>
    %147 = tpu.concatenate %27, %25 in 0 : vector<1x8xf32>, vector<1x8xf32> -> vector<2x8xf32>
    %cst_45 = arith.constant 5.000000e+00 : f32
    %148 = vector.broadcast %cst_45 : f32 to vector<2x8xf32>
    %149 = arith.addf %147, %148 : vector<2x8xf32>
    %150 = arith.mulf %147, %149 : vector<2x8xf32>
    %cst_46 = arith.constant 4.000000e+00 : f32
    %151 = vector.broadcast %cst_46 : f32 to vector<2x8xf32>
    %152 = arith.addf %150, %151 : vector<2x8xf32>
    %153 = arith.mulf %150, %152 : vector<2x8xf32>
    %cst_47 = arith.constant 6.000000e+00 : f32
    %154 = vector.broadcast %cst_47 : f32 to vector<2x8xf32>
    %155 = arith.addf %150, %154 : vector<2x8xf32>
    %156 = arith.mulf %153, %155 : vector<2x8xf32>
    %cst_48 = arith.constant 6.000000e+00 : f32
    %157 = vector.broadcast %cst_48 : f32 to vector<2x8xf32>
    %158 = arith.addf %147, %157 : vector<2x8xf32>
    %159 = math.log %158 : vector<2x8xf32>
    %160 = tpu.reciprocal %158 {approx = true} : vector<2x8xf32> -> vector<2x8xf32>
    %161 = arith.mulf %158, %160 : vector<2x8xf32>
    %cst_49 = arith.constant 2.000000e+00 : f32
    %162 = vector.broadcast %cst_49 : f32 to vector<2x8xf32>
    %163 = arith.subf %162, %161 : vector<2x8xf32>
    %164 = arith.mulf %160, %163 : vector<2x8xf32>
    %165 = arith.mulf %164, %164 : vector<2x8xf32>
    %cst_50 = arith.constant 5.000000e-01 : f32
    %166 = vector.broadcast %cst_50 : f32 to vector<2x8xf32>
    %167 = arith.subf %158, %166 : vector<2x8xf32>
    %168 = arith.mulf %167, %159 : vector<2x8xf32>
    %169 = arith.subf %168, %158 : vector<2x8xf32>
    %cst_51 = arith.constant 0.918938517 : f32
    %170 = vector.broadcast %cst_51 : f32 to vector<2x8xf32>
    %171 = arith.addf %169, %170 : vector<2x8xf32>
    %cst_52 = arith.constant 5.95238118E-4 : f32
    %172 = vector.broadcast %cst_52 : f32 to vector<2x8xf32>
    %173 = arith.mulf %165, %172 : vector<2x8xf32>
    %cst_53 = arith.constant 7.93650805E-4 : f32
    %174 = vector.broadcast %cst_53 : f32 to vector<2x8xf32>
    %175 = arith.subf %174, %173 : vector<2x8xf32>
    %176 = arith.mulf %165, %175 : vector<2x8xf32>
    %cst_54 = arith.constant 0.00277777785 : f32
    %177 = vector.broadcast %cst_54 : f32 to vector<2x8xf32>
    %178 = arith.subf %177, %176 : vector<2x8xf32>
    %179 = arith.mulf %165, %178 : vector<2x8xf32>
    %cst_55 = arith.constant 0.0833333358 : f32
    %180 = vector.broadcast %cst_55 : f32 to vector<2x8xf32>
    %181 = arith.subf %180, %179 : vector<2x8xf32>
    %182 = arith.mulf %164, %181 : vector<2x8xf32>
    %183 = arith.addf %171, %182 : vector<2x8xf32>
    %184 = math.log %156 : vector<2x8xf32>
    %185 = arith.subf %183, %184 : vector<2x8xf32>
    %cst_56 = arith.constant 3.000000e+00 : f32
    %186 = vector.broadcast %cst_56 : f32 to vector<2x8xf32>
    %187 = arith.mulf %186, %150 : vector<2x8xf32>
    %cst_57 = arith.constant 2.000000e+01 : f32
    %188 = vector.broadcast %cst_57 : f32 to vector<2x8xf32>
    %189 = arith.addf %187, %188 : vector<2x8xf32>
    %190 = arith.mulf %189, %150 : vector<2x8xf32>
    %cst_58 = arith.constant 2.400000e+01 : f32
    %191 = vector.broadcast %cst_58 : f32 to vector<2x8xf32>
    %192 = arith.addf %190, %191 : vector<2x8xf32>
    %cst_59 = arith.constant 2.000000e+00 : f32
    %193 = vector.broadcast %cst_59 : f32 to vector<2x8xf32>
    %194 = arith.mulf %193, %147 : vector<2x8xf32>
    %cst_60 = arith.constant 5.000000e+00 : f32
    %195 = vector.broadcast %cst_60 : f32 to vector<2x8xf32>
    %196 = arith.addf %194, %195 : vector<2x8xf32>
    %197 = arith.mulf %192, %196 : vector<2x8xf32>
    %cst_61 = arith.constant 5.000000e-01 : f32
    %198 = vector.broadcast %cst_61 : f32 to vector<2x8xf32>
    %199 = arith.mulf %198, %164 : vector<2x8xf32>
    %200 = arith.subf %159, %199 : vector<2x8xf32>
    %cst_62 = arith.constant 0.0039682542 : f32
    %201 = vector.broadcast %cst_62 : f32 to vector<2x8xf32>
    %202 = arith.mulf %165, %201 : vector<2x8xf32>
    %cst_63 = arith.constant 0.00833333377 : f32
    %203 = vector.broadcast %cst_63 : f32 to vector<2x8xf32>
    %204 = arith.subf %203, %202 : vector<2x8xf32>
    %205 = arith.mulf %165, %204 : vector<2x8xf32>
    %cst_64 = arith.constant 0.0833333358 : f32
    %206 = vector.broadcast %cst_64 : f32 to vector<2x8xf32>
    %207 = arith.subf %206, %205 : vector<2x8xf32>
    %208 = arith.mulf %165, %207 : vector<2x8xf32>
    %209 = arith.subf %200, %208 : vector<2x8xf32>
    %210 = tpu.reciprocal %156 {approx = true} : vector<2x8xf32> -> vector<2x8xf32>
    %211 = arith.mulf %156, %210 : vector<2x8xf32>
    %cst_65 = arith.constant 2.000000e+00 : f32
    %212 = vector.broadcast %cst_65 : f32 to vector<2x8xf32>
    %213 = arith.subf %212, %211 : vector<2x8xf32>
    %214 = arith.mulf %210, %213 : vector<2x8xf32>
    %215 = arith.mulf %197, %214 : vector<2x8xf32>
    %216 = arith.subf %209, %215 : vector<2x8xf32>
    %217 = vector.extract_strided_slice %185 {offsets = [0, 0], sizes = [1, 8], strides = [1, 1]} : vector<2x8xf32> to vector<1x8xf32>
    %218 = vector.extract_strided_slice %185 {offsets = [1, 0], sizes = [1, 8], strides = [1, 1]} : vector<2x8xf32> to vector<1x8xf32>
    %219 = vector.extract_strided_slice %216 {offsets = [0, 0], sizes = [1, 8], strides = [1, 1]} : vector<2x8xf32> to vector<1x8xf32>
    %220 = arith.subf %217, %218 : vector<1x8xf32>
    %221 = arith.subf %146, %77 : vector<16x8xf32>
    %cst_66 = arith.constant dense<0.000000e+00> : vector<8xf32>
    %222 = vector.multi_reduction <add>, %221, %cst_66 [0] : vector<16x8xf32> to vector<8xf32>
    %223 = vector.shape_cast %222 : vector<8xf32> to vector<1x8xf32>
    %224 = arith.addf %220, %223 : vector<1x8xf32>
    %225 = arith.subf %19, %23 : vector<16x8xf32>
    %226 = vector.broadcast %219 : vector<1x8xf32> to vector<16x8xf32>
    %227 = arith.subf %108, %226 : vector<16x8xf32>
    %228 = arith.mulf %225, %227 : vector<16x8xf32>
    %cst_67 = arith.constant dense<0.000000e+00> : vector<8xf32>
    %229 = vector.multi_reduction <add>, %228, %cst_67 [0] : vector<16x8xf32> to vector<8xf32>
    %230 = vector.shape_cast %229 : vector<8xf32> to vector<1x8xf32>
    %231 = arith.addf %224, %230 : vector<1x8xf32>
    %c0_68 = arith.constant 0 : index
    %c0_69 = arith.constant 0 : index
    %232 = vector.load %arg5[%c0_68, %c0_69] : memref<1x8xf32, #tpu.memory_space<vmem>>, vector<1x8xf32>
    %233 = arith.mulf %231, %39 : vector<1x8xf32>
    %cst_70 = arith.constant 0.000000e+00 : f32
    %234 = vector.broadcast %cst_70 : f32 to vector<1x8xf32>
    %235 = arith.select %15, %233, %234 : vector<1x8xi1>, vector<1x8xf32>
    %236 = arith.addf %232, %235 : vector<1x8xf32>
    %c0_71 = arith.constant 0 : index
    %c0_72 = arith.constant 0 : index
    %237 = vector.load %arg5[%c0_71, %c0_72] : memref<1x8xf32, #tpu.memory_space<vmem>>, vector<1x8xf32>
    tpu.vector_store %arg5[%c0_71, %c0_72], %236 {strides = array<i32>} : memref<1x8xf32, #tpu.memory_space<vmem>>, vector<1x8xf32>,
    return
  }
  func.func @transform_0(%arg0: i32, %arg1: i32) -> (i32, i32) {
    %c1_i32 = arith.constant 1 : i32
    %0 = arith.muli %arg0, %c1_i32 : i32
    %1 = arith.addi %0, %arg1 : i32
    %c0_i32 = arith.constant 0 : i32
    %c0_i32_0 = arith.constant 0 : i32
    return %1, %c0_i32 : i32, i32
  }
  func.func @transform_1(%arg0: i32, %arg1: i32) -> (i32, i32) {
    %c1_i32 = arith.constant 1 : i32
    %0 = arith.muli %arg0, %c1_i32 : i32
    %1 = arith.addi %0, %arg1 : i32
    %c0_i32 = arith.constant 0 : i32
    %c0_i32_0 = arith.constant 0 : i32
    return %1, %c0_i32 : i32, i32
  }
  func.func @transform_2(%arg0: i32, %arg1: i32) -> (i32, i32) {
    %c0_i32 = arith.constant 0 : i32
    %c0_i32_0 = arith.constant 0 : i32
    %c0_i32_1 = arith.constant 0 : i32
    return %c0_i32, %c0_i32_0 : i32, i32
  }
  func.func @transform_3(%arg0: i32, %arg1: i32) -> (i32, i32) {
    %c0_i32 = arith.constant 0 : i32
    %c0_i32_0 = arith.constant 0 : i32
    return %c0_i32, %arg0 : i32, i32
  }
}

module attributes {stable_mosaic.version = 11 : i64} {
  func.func @kernel(%arg0: i32, %arg1: i32, %arg2: memref<8x16xf32, #tpu.memory_space<vmem>>, %arg3: memref<8x16xf32, #tpu.memory_space<vmem>>, %arg4: memref<16x1xf32, #tpu.memory_space<vmem>>, %arg5: memref<1x8xf32, #tpu.memory_space<vmem>>) attributes {dimension_semantics = [#tpu.dimension_semantics<parallel>, #tpu.dimension_semantics<arbitrary>], iteration_bounds = array<i64: 1, 1>, scalar_prefetch = 0 : i64, scratch_operands = 0 : i64, tpu.core_type = #tpu.core_type<tc>, window_params = [{transform_indices = @transform_0, window_bounds = array<i64: 8, 16>}, {transform_indices = @transform_1, window_bounds = array<i64: 8, 16>}, {pipeline_mode = #tpu.pipeline_mode<synchronous>, transform_indices = @transform_2, window_bounds = array<i64: 16, 1>}, {transform_indices = @transform_3, window_bounds = array<i64: 1, 8>}]} {
    %c0_i32 = arith.constant 0 : i32
    %0 = arith.cmpi eq, %arg1, %c0_i32 : i32
    %1 = arith.extui %0 : i1 to i32
    %c0_i32_0 = arith.constant 0 : i32
    %2 = arith.cmpi ne, %1, %c0_i32_0 : i32
    scf.if %2 {
      %cst_73 = arith.constant 0.000000e+00 : f32
      %238 = vector.broadcast %cst_73 : f32 to vector<1x8xf32>
      %c0_74 = arith.constant 0 : index
      %c0_75 = arith.constant 0 : index
      %239 = vector.load %arg5[%c0_74, %c0_75] : memref<1x8xf32, #tpu.memory_space<vmem>>, vector<1x8xf32>
      tpu.vector_store %arg5[%c0_74, %c0_75], %238 {strides = array<i32>} : memref<1x8xf32, #tpu.memory_space<vmem>>, vector<1x8xf32>,
    } else {
    }
    %c0 = arith.constant 0 : index
    %c0_1 = arith.constant 0 : index
    %3 = vector.load %arg2[%c0, %c0_1] : memref<8x16xf32, #tpu.memory_space<vmem>>, vector<8x16xf32>
    %4 = tpu.transpose %3, [1, 0] : vector<8x16xf32> -> vector<16x8xf32>
    %c0_2 = arith.constant 0 : index
    %c0_3 = arith.constant 0 : index
    %5 = vector.load %arg3[%c0_2, %c0_3] : memref<8x16xf32, #tpu.memory_space<vmem>>, vector<8x16xf32>
    %6 = tpu.transpose %5, [1, 0] : vector<8x16xf32> -> vector<16x8xf32>
    %c0_4 = arith.constant 0 : index
    %c0_5 = arith.constant 0 : index
    %7 = vector.load %arg4[%c0_4, %c0_5] : memref<16x1xf32, #tpu.memory_space<vmem>>, vector<16x1xf32>
    %c1_i32 = arith.constant 1 : i32
    %8 = arith.muli %arg0, %c1_i32 : i32
    %9 = arith.addi %8, %arg1 : i32
    %c8_i32 = arith.constant 8 : i32
    %10 = arith.muli %9, %c8_i32 : i32
    %11 = tpu.iota {dimensions = array<i32: 1>} : vector<1x8xi32>
    %12 = vector.broadcast %10 : i32 to vector<1x8xi32>
    %13 = arith.addi %11, %12 : vector<1x8xi32>
    %c8_i32_6 = arith.constant 8 : i32
    %14 = vector.broadcast %c8_i32_6 : i32 to vector<1x8xi32>
    %15 = arith.cmpi slt, %13, %14 : vector<1x8xi32>
    %cst = arith.constant 1.000000e+00 : f32
    %16 = vector.shape_cast %15 : vector<1x8xi1> to vector<1x8xi1>
    %17 = vector.broadcast %16 : vector<1x8xi1> to vector<16x8xi1>
    %18 = vector.broadcast %cst : f32 to vector<16x8xf32>
    %19 = arith.select %17, %4, %18 : vector<16x8xi1>, vector<16x8xf32>
    %cst_7 = arith.constant 1.000000e+00 : f32
    %20 = vector.shape_cast %15 : vector<1x8xi1> to vector<1x8xi1>
    %21 = vector.broadcast %20 : vector<1x8xi1> to vector<16x8xi1>
    %22 = vector.broadcast %cst_7 : f32 to vector<16x8xf32>
    %23 = arith.select %21, %6, %22 : vector<16x8xi1>, vector<16x8xf32>
    %cst_8 = arith.constant dense<0.000000e+00> : vector<8xf32>
    %24 = vector.multi_reduction <add>, %23, %cst_8 [0] : vector<16x8xf32> to vector<8xf32>
    %25 = vector.shape_cast %24 : vector<8xf32> to vector<1x8xf32>
    %cst_9 = arith.constant dense<0.000000e+00> : vector<8xf32>
    %26 = vector.multi_reduction <add>, %19, %cst_9 [0] : vector<16x8xf32> to vector<8xf32>
    %27 = vector.shape_cast %26 : vector<8xf32> to vector<1x8xf32>
    %28 = vector.broadcast %7 : vector<16x1xf32> to vector<16x8xf32>
    %29 = arith.mulf %23, %28 : vector<16x8xf32>
    %cst_10 = arith.constant dense<0.000000e+00> : vector<8xf32>
    %30 = vector.multi_reduction <add>, %29, %cst_10 [0] : vector<16x8xf32> to vector<8xf32>
    %31 = vector.shape_cast %30 : vector<8xf32> to vector<1x8xf32>
    %cst_11 = arith.constant 1.600000e+01 : f32
    %32 = vector.broadcast %cst_11 : f32 to vector<1x8xf32>
    %33 = arith.mulf %32, %31 : vector<1x8xf32>
    %34 = tpu.reciprocal %25 {approx = true} : vector<1x8xf32> -> vector<1x8xf32>
    %35 = arith.mulf %25, %34 : vector<1x8xf32>
    %cst_12 = arith.constant 2.000000e+00 : f32
    %36 = vector.broadcast %cst_12 : f32 to vector<1x8xf32>
    %37 = arith.subf %36, %35 : vector<1x8xf32>
    %38 = arith.mulf %34, %37 : vector<1x8xf32>
    %39 = arith.mulf %33, %38 : vector<1x8xf32>
    %cst_13 = arith.constant 5.000000e+00 : f32
    %40 = vector.broadcast %cst_13 : f32 to vector<16x8xf32>
    %41 = arith.addf %19, %40 : vector<16x8xf32>
    %42 = arith.mulf %19, %41 : vector<16x8xf32>
    %cst_14 = arith.constant 4.000000e+00 : f32
    %43 = vector.broadcast %cst_14 : f32 to vector<16x8xf32>
    %44 = arith.addf %42, %43 : vector<16x8xf32>
    %45 = arith.mulf %42, %44 : vector<16x8xf32>
    %cst_15 = arith.constant 6.000000e+00 : f32
    %46 = vector.broadcast %cst_15 : f32 to vector<16x8xf32>
    %47 = arith.addf %42, %46 : vector<16x8xf32>
    %48 = arith.mulf %45, %47 : vector<16x8xf32>
    %cst_16 = arith.constant 6.000000e+00 : f32
    %49 = vector.broadcast %cst_16 : f32 to vector<16x8xf32>
    %50 = arith.addf %19, %49 : vector<16x8xf32>
    %51 = math.log %50 : vector<16x8xf32>
    %52 = tpu.reciprocal %50 {approx = true} : vector<16x8xf32> -> vector<16x8xf32>
    %53 = arith.mulf %50, %52 : vector<16x8xf32>
    %cst_17 = arith.constant 2.000000e+00 : f32
    %54 = vector.broadcast %cst_17 : f32 to vector<16x8xf32>
    %55 = arith.subf %54, %53 : vector<16x8xf32>
    %56 = arith.mulf %52, %55 : vector<16x8xf32>
    %57 = arith.mulf %56, %56 : vector<16x8xf32>
    %cst_18 = arith.constant 5.000000e-01 : f32
    %58 = vector.broadcast %cst_18 : f32 to vector<16x8xf32>
    %59 = arith.subf %50, %58 : vector<16x8xf32>
    %60 = arith.mulf %59, %51 : vector<16x8xf32>
    %61 = arith.subf %60, %50 : vector<16x8xf32>
    %cst_19 = arith.constant 0.918938517 : f32
    %62 = vector.broadcast %cst_19 : f32 to vector<16x8xf32>
    %63 = arith.addf %61, %62 : vector<16x8xf32>
    %cst_20 = arith.constant 5.95238118E-4 : f32
    %64 = vector.broadcast %cst_20 : f32 to vector<16x8xf32>
    %65 = arith.mulf %57, %64 : vector<16x8xf32>
    %cst_21 = arith.constant 7.93650805E-4 : f32
    %66 = vector.broadcast %cst_21 : f32 to vector<16x8xf32>
    %67 = arith.subf %66, %65 : vector<16x8xf32>
    %68 = arith.mulf %57, %67 : vector<16x8xf32>
    %cst_22 = arith.constant 0.00277777785 : f32
    %69 = vector.broadcast %cst_22 : f32 to vector<16x8xf32>
    %70 = arith.subf %69, %68 : vector<16x8xf32>
    %71 = arith.mulf %57, %70 : vector<16x8xf32>
    %cst_23 = arith.constant 0.0833333358 : f32
    %72 = vector.broadcast %cst_23 : f32 to vector<16x8xf32>
    %73 = arith.subf %72, %71 : vector<16x8xf32>
    %74 = arith.mulf %56, %73 : vector<16x8xf32>
    %75 = arith.addf %63, %74 : vector<16x8xf32>
    %76 = math.log %48 : vector<16x8xf32>
    %77 = arith.subf %75, %76 : vector<16x8xf32>
    %cst_24 = arith.constant 3.000000e+00 : f32
    %78 = vector.broadcast %cst_24 : f32 to vector<16x8xf32>
    %79 = arith.mulf %78, %42 : vector<16x8xf32>
    %cst_25 = arith.constant 2.000000e+01 : f32
    %80 = vector.broadcast %cst_25 : f32 to vector<16x8xf32>
    %81 = arith.addf %79, %80 : vector<16x8xf32>
    %82 = arith.mulf %81, %42 : vector<16x8xf32>
    %cst_26 = arith.constant 2.400000e+01 : f32
    %83 = vector.broadcast %cst_26 : f32 to vector<16x8xf32>
    %84 = arith.addf %82, %83 : vector<16x8xf32>
    %cst_27 = arith.constant 2.000000e+00 : f32
    %85 = vector.broadcast %cst_27 : f32 to vector<16x8xf32>
    %86 = arith.mulf %85, %19 : vector<16x8xf32>
    %cst_28 = arith.constant 5.000000e+00 : f32
    %87 = vector.broadcast %cst_28 : f32 to vector<16x8xf32>
    %88 = arith.addf %86, %87 : vector<16x8xf32>
    %89 = arith.mulf %84, %88 : vector<16x8xf32>
    %cst_29 = arith.constant 5.000000e-01 : f32
    %90 = vector.broadcast %cst_29 : f32 to vector<16x8xf32>
    %91 = arith.mulf %90, %56 : vector<16x8xf32>
    %92 = arith.subf %51, %91 : vector<16x8xf32>
    %cst_30 = arith.constant 0.0039682542 : f32
    %93 = vector.broadcast %cst_30 : f32 to vector<16x8xf32>
    %94 = arith.mulf %57, %93 : vector<16x8xf32>
    %cst_31 = arith.constant 0.00833333377 : f32
    %95 = vector.broadcast %cst_31 : f32 to vector<16x8xf32>
    %96 = arith.subf %95, %94 : vector<16x8xf32>
    %97 = arith.mulf %57, %96 : vector<16x8xf32>
    %cst_32 = arith.constant 0.0833333358 : f32
    %98 = vector.broadcast %cst_32 : f32 to vector<16x8xf32>
    %99 = arith.subf %98, %97 : vector<16x8xf32>
    %100 = arith.mulf %57, %99 : vector<16x8xf32>
    %101 = arith.subf %92, %100 : vector<16x8xf32>
    %102 = tpu.reciprocal %48 {approx = true} : vector<16x8xf32> -> vector<16x8xf32>
    %103 = arith.mulf %48, %102 : vector<16x8xf32>
    %cst_33 = arith.constant 2.000000e+00 : f32
    %104 = vector.broadcast %cst_33 : f32 to vector<16x8xf32>
    %105 = arith.subf %104, %103 : vector<16x8xf32>
    %106 = arith.mulf %102, %105 : vector<16x8xf32>
    %107 = arith.mulf %89, %106 : vector<16x8xf32>
    %108 = arith.subf %101, %107 : vector<16x8xf32>
    %cst_34 = arith.constant 5.000000e+00 : f32
    %109 = vector.broadcast %cst_34 : f32 to vector<16x8xf32>
    %110 = arith.addf %23, %109 : vector<16x8xf32>
    %111 = arith.mulf %23, %110 : vector<16x8xf32>
    %cst_35 = arith.constant 4.000000e+00 : f32
    %112 = vector.broadcast %cst_35 : f32 to vector<16x8xf32>
    %113 = arith.addf %111, %112 : vector<16x8xf32>
    %114 = arith.mulf %111, %113 : vector<16x8xf32>
    %cst_36 = arith.constant 6.000000e+00 : f32
    %115 = vector.broadcast %cst_36 : f32 to vector<16x8xf32>
    %116 = arith.addf %111, %115 : vector<16x8xf32>
    %117 = arith.mulf %114, %116 : vector<16x8xf32>
    %cst_37 = arith.constant 6.000000e+00 : f32
    %118 = vector.broadcast %cst_37 : f32 to vector<16x8xf32>
    %119 = arith.addf %23, %118 : vector<16x8xf32>
    %120 = math.log %119 : vector<16x8xf32>
    %121 = tpu.reciprocal %119 {approx = true} : vector<16x8xf32> -> vector<16x8xf32>
    %122 = arith.mulf %119, %121 : vector<16x8xf32>
    %cst_38 = arith.constant 2.000000e+00 : f32
    %123 = vector.broadcast %cst_38 : f32 to vector<16x8xf32>
    %124 = arith.subf %123, %122 : vector<16x8xf32>
    %125 = arith.mulf %121, %124 : vector<16x8xf32>
    %126 = arith.mulf %125, %125 : vector<16x8xf32>
    %cst_39 = arith.constant 5.000000e-01 : f32
    %127 = vector.broadcast %cst_39 : f32 to vector<16x8xf32>
    %128 = arith.subf %119, %127 : vector<16x8xf32>
    %129 = arith.mulf %128, %120 : vector<16x8xf32>
    %130 = arith.subf %129, %119 : vector<16x8xf32>
    %cst_40 = arith.constant 0.918938517 : f32
    %131 = vector.broadcast %cst_40 : f32 to vector<16x8xf32>
    %132 = arith.addf %130, %131 : vector<16x8xf32>
    %cst_41 = arith.constant 5.95238118E-4 : f32
    %133 = vector.broadcast %cst_41 : f32 to vector<16x8xf32>
    %134 = arith.mulf %126, %133 : vector<16x8xf32>
    %cst_42 = arith.constant 7.93650805E-4 : f32
    %135 = vector.broadcast %cst_42 : f32 to vector<16x8xf32>
    %136 = arith.subf %135, %134 : vector<16x8xf32>
    %137 = arith.mulf %126, %136 : vector<16x8xf32>
    %cst_43 = arith.constant 0.00277777785 : f32
    %138 = vector.broadcast %cst_43 : f32 to vector<16x8xf32>
    %139 = arith.subf %138, %137 : vector<16x8xf32>
    %140 = arith.mulf %126, %139 : vector<16x8xf32>
    %cst_44 = arith.constant 0.0833333358 : f32
    %141 = vector.broadcast %cst_44 : f32 to vector<16x8xf32>
    %142 = arith.subf %141, %140 : vector<16x8xf32>
    %143 = arith.mulf %125, %142 : vector<16x8xf32>
    %144 = arith.addf %132, %143 : vector<16x8xf32>
    %145 = math.log %117 : vector<16x8xf32>
    %146 = arith.subf %144, %145 : vector<16x8xf32>
    %147 = tpu.concatenate %27, %25 in 0 : vector<1x8xf32>, vector<1x8xf32> -> vector<2x8xf32>
    %cst_45 = arith.constant 5.000000e+00 : f32
    %148 = vector.broadcast %cst_45 : f32 to vector<2x8xf32>
    %149 = arith.addf %147, %148 : vector<2x8xf32>
    %150 = arith.mulf %147, %149 : vector<2x8xf32>
    %cst_46 = arith.constant 4.000000e+00 : f32
    %151 = vector.broadcast %cst_46 : f32 to vector<2x8xf32>
    %152 = arith.addf %150, %151 : vector<2x8xf32>
    %153 = arith.mulf %150, %152 : vector<2x8xf32>
    %cst_47 = arith.constant 6.000000e+00 : f32
    %154 = vector.broadcast %cst_47 : f32 to vector<2x8xf32>
    %155 = arith.addf %150, %154 : vector<2x8xf32>
    %156 = arith.mulf %153, %155 : vector<2x8xf32>
    %cst_48 = arith.constant 6.000000e+00 : f32
    %157 = vector.broadcast %cst_48 : f32 to vector<2x8xf32>
    %158 = arith.addf %147, %157 : vector<2x8xf32>
    %159 = math.log %158 : vector<2x8xf32>
    %160 = tpu.reciprocal %158 {approx = true} : vector<2x8xf32> -> vector<2x8xf32>
    %161 = arith.mulf %158, %160 : vector<2x8xf32>
    %cst_49 = arith.constant 2.000000e+00 : f32
    %162 = vector.broadcast %cst_49 : f32 to vector<2x8xf32>
    %163 = arith.subf %162, %161 : vector<2x8xf32>
    %164 = arith.mulf %160, %163 : vector<2x8xf32>
    %165 = arith.mulf %164, %164 : vector<2x8xf32>
    %cst_50 = arith.constant 5.000000e-01 : f32
    %166 = vector.broadcast %cst_50 : f32 to vector<2x8xf32>
    %167 = arith.subf %158, %166 : vector<2x8xf32>
    %168 = arith.mulf %167, %159 : vector<2x8xf32>
    %169 = arith.subf %168, %158 : vector<2x8xf32>
    %cst_51 = arith.constant 0.918938517 : f32
    %170 = vector.broadcast %cst_51 : f32 to vector<2x8xf32>
    %171 = arith.addf %169, %170 : vector<2x8xf32>
    %cst_52 = arith.constant 5.95238118E-4 : f32
    %172 = vector.broadcast %cst_52 : f32 to vector<2x8xf32>
    %173 = arith.mulf %165, %172 : vector<2x8xf32>
    %cst_53 = arith.constant 7.93650805E-4 : f32
    %174 = vector.broadcast %cst_53 : f32 to vector<2x8xf32>
    %175 = arith.subf %174, %173 : vector<2x8xf32>
    %176 = arith.mulf %165, %175 : vector<2x8xf32>
    %cst_54 = arith.constant 0.00277777785 : f32
    %177 = vector.broadcast %cst_54 : f32 to vector<2x8xf32>
    %178 = arith.subf %177, %176 : vector<2x8xf32>
    %179 = arith.mulf %165, %178 : vector<2x8xf32>
    %cst_55 = arith.constant 0.0833333358 : f32
    %180 = vector.broadcast %cst_55 : f32 to vector<2x8xf32>
    %181 = arith.subf %180, %179 : vector<2x8xf32>
    %182 = arith.mulf %164, %181 : vector<2x8xf32>
    %183 = arith.addf %171, %182 : vector<2x8xf32>
    %184 = math.log %156 : vector<2x8xf32>
    %185 = arith.subf %183, %184 : vector<2x8xf32>
    %cst_56 = arith.constant 3.000000e+00 : f32
    %186 = vector.broadcast %cst_56 : f32 to vector<2x8xf32>
    %187 = arith.mulf %186, %150 : vector<2x8xf32>
    %cst_57 = arith.constant 2.000000e+01 : f32
    %188 = vector.broadcast %cst_57 : f32 to vector<2x8xf32>
    %189 = arith.addf %187, %188 : vector<2x8xf32>
    %190 = arith.mulf %189, %150 : vector<2x8xf32>
    %cst_58 = arith.constant 2.400000e+01 : f32
    %191 = vector.broadcast %cst_58 : f32 to vector<2x8xf32>
    %192 = arith.addf %190, %191 : vector<2x8xf32>
    %cst_59 = arith.constant 2.000000e+00 : f32
    %193 = vector.broadcast %cst_59 : f32 to vector<2x8xf32>
    %194 = arith.mulf %193, %147 : vector<2x8xf32>
    %cst_60 = arith.constant 5.000000e+00 : f32
    %195 = vector.broadcast %cst_60 : f32 to vector<2x8xf32>
    %196 = arith.addf %194, %195 : vector<2x8xf32>
    %197 = arith.mulf %192, %196 : vector<2x8xf32>
    %cst_61 = arith.constant 5.000000e-01 : f32
    %198 = vector.broadcast %cst_61 : f32 to vector<2x8xf32>
    %199 = arith.mulf %198, %164 : vector<2x8xf32>
    %200 = arith.subf %159, %199 : vector<2x8xf32>
    %cst_62 = arith.constant 0.0039682542 : f32
    %201 = vector.broadcast %cst_62 : f32 to vector<2x8xf32>
    %202 = arith.mulf %165, %201 : vector<2x8xf32>
    %cst_63 = arith.constant 0.00833333377 : f32
    %203 = vector.broadcast %cst_63 : f32 to vector<2x8xf32>
    %204 = arith.subf %203, %202 : vector<2x8xf32>
    %205 = arith.mulf %165, %204 : vector<2x8xf32>
    %cst_64 = arith.constant 0.0833333358 : f32
    %206 = vector.broadcast %cst_64 : f32 to vector<2x8xf32>
    %207 = arith.subf %206, %205 : vector<2x8xf32>
    %208 = arith.mulf %165, %207 : vector<2x8xf32>
    %209 = arith.subf %200, %208 : vector<2x8xf32>
    %210 = tpu.reciprocal %156 {approx = true} : vector<2x8xf32> -> vector<2x8xf32>
    %211 = arith.mulf %156, %210 : vector<2x8xf32>
    %cst_65 = arith.constant 2.000000e+00 : f32
    %212 = vector.broadcast %cst_65 : f32 to vector<2x8xf32>
    %213 = arith.subf %212, %211 : vector<2x8xf32>
    %214 = arith.mulf %210, %213 : vector<2x8xf32>
    %215 = arith.mulf %197, %214 : vector<2x8xf32>
    %216 = arith.subf %209, %215 : vector<2x8xf32>
    %217 = vector.extract_strided_slice %185 {offsets = [0, 0], sizes = [1, 8], strides = [1, 1]} : vector<2x8xf32> to vector<1x8xf32>
    %218 = vector.extract_strided_slice %185 {offsets = [1, 0], sizes = [1, 8], strides = [1, 1]} : vector<2x8xf32> to vector<1x8xf32>
    %219 = vector.extract_strided_slice %216 {offsets = [0, 0], sizes = [1, 8], strides = [1, 1]} : vector<2x8xf32> to vector<1x8xf32>
    %220 = arith.subf %217, %218 : vector<1x8xf32>
    %221 = arith.subf %146, %77 : vector<16x8xf32>
    %cst_66 = arith.constant dense<0.000000e+00> : vector<8xf32>
    %222 = vector.multi_reduction <add>, %221, %cst_66 [0] : vector<16x8xf32> to vector<8xf32>
    %223 = vector.shape_cast %222 : vector<8xf32> to vector<1x8xf32>
    %224 = arith.addf %220, %223 : vector<1x8xf32>
    %225 = arith.subf %19, %23 : vector<16x8xf32>
    %226 = vector.broadcast %219 : vector<1x8xf32> to vector<16x8xf32>
    %227 = arith.subf %108, %226 : vector<16x8xf32>
    %228 = arith.mulf %225, %227 : vector<16x8xf32>
    %cst_67 = arith.constant dense<0.000000e+00> : vector<8xf32>
    %229 = vector.multi_reduction <add>, %228, %cst_67 [0] : vector<16x8xf32> to vector<8xf32>
    %230 = vector.shape_cast %229 : vector<8xf32> to vector<1x8xf32>
    %231 = arith.addf %224, %230 : vector<1x8xf32>
    %c0_68 = arith.constant 0 : index
    %c0_69 = arith.constant 0 : index
    %232 = vector.load %arg5[%c0_68, %c0_69] : memref<1x8xf32, #tpu.memory_space<vmem>>, vector<1x8xf32>
    %233 = arith.mulf %231, %39 : vector<1x8xf32>
    %cst_70 = arith.constant 0.000000e+00 : f32
    %234 = vector.broadcast %cst_70 : f32 to vector<1x8xf32>
    %235 = arith.select %15, %233, %234 : vector<1x8xi1>, vector<1x8xf32>
    %236 = arith.addf %232, %235 : vector<1x8xf32>
    %c0_71 = arith.constant 0 : index
    %c0_72 = arith.constant 0 : index
    %237 = vector.load %arg5[%c0_71, %c0_72] : memref<1x8xf32, #tpu.memory_space<vmem>>, vector<1x8xf32>
    tpu.vector_store %arg5[%c0_71, %c0_72], %236 {strides = array<i32>} : memref<1x8xf32, #tpu.memory_space<vmem>>, vector<1x8xf32>,
    return
  }
  func.func @transform_0(%arg0: i32, %arg1: i32) -> (i32, i32) {
    %c1_i32 = arith.constant 1 : i32
    %0 = arith.muli %arg0, %c1_i32 : i32
    %1 = arith.addi %0, %arg1 : i32
    %c0_i32 = arith.constant 0 : i32
    %c0_i32_0 = arith.constant 0 : i32
    return %1, %c0_i32 : i32, i32
  }
  func.func @transform_1(%arg0: i32, %arg1: i32) -> (i32, i32) {
    %c1_i32 = arith.constant 1 : i32
    %0 = arith.muli %arg0, %c1_i32 : i32
    %1 = arith.addi %0, %arg1 : i32
    %c0_i32 = arith.constant 0 : i32
    %c0_i32_0 = arith.constant 0 : i32
    return %1, %c0_i32 : i32, i32
  }
  func.func @transform_2(%arg0: i32, %arg1: i32) -> (i32, i32) {
    %c0_i32 = arith.constant 0 : i32
    %c0_i32_0 = arith.constant 0 : i32
    %c0_i32_1 = arith.constant 0 : i32
    return %c0_i32, %c0_i32_0 : i32, i32
  }
  func.func @transform_3(%arg0: i32, %arg1: i32) -> (i32, i32) {
    %c0_i32 = arith.constant 0 : i32
    %c0_i32_0 = arith.constant 0 : i32
    return %c0_i32, %arg0 : i32, i32
  }
}

module attributes {stable_mosaic.version = 11 : i64} {
  func.func @kernel(%arg0: i32, %arg1: i32, %arg2: memref<16x8xf32, #tpu.memory_space<vmem>>, %arg3: memref<16x8xf32, #tpu.memory_space<vmem>>, %arg4: memref<16x1xf32, #tpu.memory_space<vmem>>, %arg5: memref<1x8xf32, #tpu.memory_space<vmem>>) attributes {dimension_semantics = [#tpu.dimension_semantics<parallel>, #tpu.dimension_semantics<arbitrary>], iteration_bounds = array<i64: 1, 1>, scalar_prefetch = 0 : i64, scratch_operands = 0 : i64, tpu.core_type = #tpu.core_type<tc>, window_params = [{transform_indices = @transform_0, window_bounds = array<i64: 16, 8>}, {transform_indices = @transform_1, window_bounds = array<i64: 16, 8>}, {pipeline_mode = #tpu.pipeline_mode<synchronous>, transform_indices = @transform_2, window_bounds = array<i64: 16, 1>}, {transform_indices = @transform_3, window_bounds = array<i64: 1, 8>}]} {
    %c0_i32 = arith.constant 0 : i32
    %0 = arith.cmpi eq, %arg1, %c0_i32 : i32
    %1 = arith.extui %0 : i1 to i32
    %c0_i32_0 = arith.constant 0 : i32
    %2 = arith.cmpi ne, %1, %c0_i32_0 : i32
    scf.if %2 {
      %cst_73 = arith.constant 0.000000e+00 : f32
      %236 = vector.broadcast %cst_73 : f32 to vector<1x8xf32>
      %c0_74 = arith.constant 0 : index
      %c0_75 = arith.constant 0 : index
      %237 = vector.load %arg5[%c0_74, %c0_75] : memref<1x8xf32, #tpu.memory_space<vmem>>, vector<1x8xf32>
      tpu.vector_store %arg5[%c0_74, %c0_75], %236 {strides = array<i32>} : memref<1x8xf32, #tpu.memory_space<vmem>>, vector<1x8xf32>,
    } else {
    }
    %c0 = arith.constant 0 : index
    %c0_1 = arith.constant 0 : index
    %3 = vector.load %arg2[%c0, %c0_1] : memref<16x8xf32, #tpu.memory_space<vmem>>, vector<16x8xf32>
    %c0_2 = arith.constant 0 : index
    %c0_3 = arith.constant 0 : index
    %4 = vector.load %arg3[%c0_2, %c0_3] : memref<16x8xf32, #tpu.memory_space<vmem>>, vector<16x8xf32>
    %c0_4 = arith.constant 0 : index
    %c0_5 = arith.constant 0 : index
    %5 = vector.load %arg4[%c0_4, %c0_5] : memref<16x1xf32, #tpu.memory_space<vmem>>, vector<16x1xf32>
    %c1_i32 = arith.constant 1 : i32
    %6 = arith.muli %arg0, %c1_i32 : i32
    %7 = arith.addi %6, %arg1 : i32
    %c8_i32 = arith.constant 8 : i32
    %8 = arith.muli %7, %c8_i32 : i32
    %9 = tpu.iota {dimensions = array<i32: 1>} : vector<1x8xi32>
    %10 = vector.broadcast %8 : i32 to vector<1x8xi32>
    %11 = arith.addi %9, %10 : vector<1x8xi32>
    %c8_i32_6 = arith.constant 8 : i32
    %12 = vector.broadcast %c8_i32_6 : i32 to vector<1x8xi32>
    %13 = arith.cmpi slt, %11, %12 : vector<1x8xi32>
    %cst = arith.constant 1.000000e+00 : f32
    %14 = vector.shape_cast %13 : vector<1x8xi1> to vector<1x8xi1>
    %15 = vector.broadcast %14 : vector<1x8xi1> to vector<16x8xi1>
    %16 = vector.broadcast %cst : f32 to vector<16x8xf32>
    %17 = arith.select %15, %3, %16 : vector<16x8xi1>, vector<16x8xf32>
    %cst_7 = arith.constant 1.000000e+00 : f32
    %18 = vector.shape_cast %13 : vector<1x8xi1> to vector<1x8xi1>
    %19 = vector.broadcast %18 : vector<1x8xi1> to vector<16x8xi1>
    %20 = vector.broadcast %cst_7 : f32 to vector<16x8xf32>
    %21 = arith.select %19, %4, %20 : vector<16x8xi1>, vector<16x8xf32>
    %cst_8 = arith.constant dense<0.000000e+00> : vector<8xf32>
    %22 = vector.multi_reduction <add>, %21, %cst_8 [0] : vector<16x8xf32> to vector<8xf32>
    %23 = vector.shape_cast %22 : vector<8xf32> to vector<1x8xf32>
    %cst_9 = arith.constant dense<0.000000e+00> : vector<8xf32>
    %24 = vector.multi_reduction <add>, %17, %cst_9 [0] : vector<16x8xf32> to vector<8xf32>
    %25 = vector.shape_cast %24 : vector<8xf32> to vector<1x8xf32>
    %26 = vector.broadcast %5 : vector<16x1xf32> to vector<16x8xf32>
    %27 = arith.mulf %21, %26 : vector<16x8xf32>
    %cst_10 = arith.constant dense<0.000000e+00> : vector<8xf32>
    %28 = vector.multi_reduction <add>, %27, %cst_10 [0] : vector<16x8xf32> to vector<8xf32>
    %29 = vector.shape_cast %28 : vector<8xf32> to vector<1x8xf32>
    %cst_11 = arith.constant 1.600000e+01 : f32
    %30 = vector.broadcast %cst_11 : f32 to vector<1x8xf32>
    %31 = arith.mulf %30, %29 : vector<1x8xf32>
    %32 = tpu.reciprocal %23 {approx = true} : vector<1x8xf32> -> vector<1x8xf32>
    %33 = arith.mulf %23, %32 : vector<1x8xf32>
    %cst_12 = arith.constant 2.000000e+00 : f32
    %34 = vector.broadcast %cst_12 : f32 to vector<1x8xf32>
    %35 = arith.subf %34, %33 : vector<1x8xf32>
    %36 = arith.mulf %32, %35 : vector<1x8xf32>
    %37 = arith.mulf %31, %36 : vector<1x8xf32>
    %cst_13 = arith.constant 5.000000e+00 : f32
    %38 = vector.broadcast %cst_13 : f32 to vector<16x8xf32>
    %39 = arith.addf %17, %38 : vector<16x8xf32>
    %40 = arith.mulf %17, %39 : vector<16x8xf32>
    %cst_14 = arith.constant 4.000000e+00 : f32
    %41 = vector.broadcast %cst_14 : f32 to vector<16x8xf32>
    %42 = arith.addf %40, %41 : vector<16x8xf32>
    %43 = arith.mulf %40, %42 : vector<16x8xf32>
    %cst_15 = arith.constant 6.000000e+00 : f32
    %44 = vector.broadcast %cst_15 : f32 to vector<16x8xf32>
    %45 = arith.addf %40, %44 : vector<16x8xf32>
    %46 = arith.mulf %43, %45 : vector<16x8xf32>
    %cst_16 = arith.constant 6.000000e+00 : f32
    %47 = vector.broadcast %cst_16 : f32 to vector<16x8xf32>
    %48 = arith.addf %17, %47 : vector<16x8xf32>
    %49 = math.log %48 : vector<16x8xf32>
    %50 = tpu.reciprocal %48 {approx = true} : vector<16x8xf32> -> vector<16x8xf32>
    %51 = arith.mulf %48, %50 : vector<16x8xf32>
    %cst_17 = arith.constant 2.000000e+00 : f32
    %52 = vector.broadcast %cst_17 : f32 to vector<16x8xf32>
    %53 = arith.subf %52, %51 : vector<16x8xf32>
    %54 = arith.mulf %50, %53 : vector<16x8xf32>
    %55 = arith.mulf %54, %54 : vector<16x8xf32>
    %cst_18 = arith.constant 5.000000e-01 : f32
    %56 = vector.broadcast %cst_18 : f32 to vector<16x8xf32>
    %57 = arith.subf %48, %56 : vector<16x8xf32>
    %58 = arith.mulf %57, %49 : vector<16x8xf32>
    %59 = arith.subf %58, %48 : vector<16x8xf32>
    %cst_19 = arith.constant 0.918938517 : f32
    %60 = vector.broadcast %cst_19 : f32 to vector<16x8xf32>
    %61 = arith.addf %59, %60 : vector<16x8xf32>
    %cst_20 = arith.constant 5.95238118E-4 : f32
    %62 = vector.broadcast %cst_20 : f32 to vector<16x8xf32>
    %63 = arith.mulf %55, %62 : vector<16x8xf32>
    %cst_21 = arith.constant 7.93650805E-4 : f32
    %64 = vector.broadcast %cst_21 : f32 to vector<16x8xf32>
    %65 = arith.subf %64, %63 : vector<16x8xf32>
    %66 = arith.mulf %55, %65 : vector<16x8xf32>
    %cst_22 = arith.constant 0.00277777785 : f32
    %67 = vector.broadcast %cst_22 : f32 to vector<16x8xf32>
    %68 = arith.subf %67, %66 : vector<16x8xf32>
    %69 = arith.mulf %55, %68 : vector<16x8xf32>
    %cst_23 = arith.constant 0.0833333358 : f32
    %70 = vector.broadcast %cst_23 : f32 to vector<16x8xf32>
    %71 = arith.subf %70, %69 : vector<16x8xf32>
    %72 = arith.mulf %54, %71 : vector<16x8xf32>
    %73 = arith.addf %61, %72 : vector<16x8xf32>
    %74 = math.log %46 : vector<16x8xf32>
    %75 = arith.subf %73, %74 : vector<16x8xf32>
    %cst_24 = arith.constant 3.000000e+00 : f32
    %76 = vector.broadcast %cst_24 : f32 to vector<16x8xf32>
    %77 = arith.mulf %76, %40 : vector<16x8xf32>
    %cst_25 = arith.constant 2.000000e+01 : f32
    %78 = vector.broadcast %cst_25 : f32 to vector<16x8xf32>
    %79 = arith.addf %77, %78 : vector<16x8xf32>
    %80 = arith.mulf %79, %40 : vector<16x8xf32>
    %cst_26 = arith.constant 2.400000e+01 : f32
    %81 = vector.broadcast %cst_26 : f32 to vector<16x8xf32>
    %82 = arith.addf %80, %81 : vector<16x8xf32>
    %cst_27 = arith.constant 2.000000e+00 : f32
    %83 = vector.broadcast %cst_27 : f32 to vector<16x8xf32>
    %84 = arith.mulf %83, %17 : vector<16x8xf32>
    %cst_28 = arith.constant 5.000000e+00 : f32
    %85 = vector.broadcast %cst_28 : f32 to vector<16x8xf32>
    %86 = arith.addf %84, %85 : vector<16x8xf32>
    %87 = arith.mulf %82, %86 : vector<16x8xf32>
    %cst_29 = arith.constant 5.000000e-01 : f32
    %88 = vector.broadcast %cst_29 : f32 to vector<16x8xf32>
    %89 = arith.mulf %88, %54 : vector<16x8xf32>
    %90 = arith.subf %49, %89 : vector<16x8xf32>
    %cst_30 = arith.constant 0.0039682542 : f32
    %91 = vector.broadcast %cst_30 : f32 to vector<16x8xf32>
    %92 = arith.mulf %55, %91 : vector<16x8xf32>
    %cst_31 = arith.constant 0.00833333377 : f32
    %93 = vector.broadcast %cst_31 : f32 to vector<16x8xf32>
    %94 = arith.subf %93, %92 : vector<16x8xf32>
    %95 = arith.mulf %55, %94 : vector<16x8xf32>
    %cst_32 = arith.constant 0.0833333358 : f32
    %96 = vector.broadcast %cst_32 : f32 to vector<16x8xf32>
    %97 = arith.subf %96, %95 : vector<16x8xf32>
    %98 = arith.mulf %55, %97 : vector<16x8xf32>
    %99 = arith.subf %90, %98 : vector<16x8xf32>
    %100 = tpu.reciprocal %46 {approx = true} : vector<16x8xf32> -> vector<16x8xf32>
    %101 = arith.mulf %46, %100 : vector<16x8xf32>
    %cst_33 = arith.constant 2.000000e+00 : f32
    %102 = vector.broadcast %cst_33 : f32 to vector<16x8xf32>
    %103 = arith.subf %102, %101 : vector<16x8xf32>
    %104 = arith.mulf %100, %103 : vector<16x8xf32>
    %105 = arith.mulf %87, %104 : vector<16x8xf32>
    %106 = arith.subf %99, %105 : vector<16x8xf32>
    %cst_34 = arith.constant 5.000000e+00 : f32
    %107 = vector.broadcast %cst_34 : f32 to vector<16x8xf32>
    %108 = arith.addf %21, %107 : vector<16x8xf32>
    %109 = arith.mulf %21, %108 : vector<16x8xf32>
    %cst_35 = arith.constant 4.000000e+00 : f32
    %110 = vector.broadcast %cst_35 : f32 to vector<16x8xf32>
    %111 = arith.addf %109, %110 : vector<16x8xf32>
    %112 = arith.mulf %109, %111 : vector<16x8xf32>
    %cst_36 = arith.constant 6.000000e+00 : f32
    %113 = vector.broadcast %cst_36 : f32 to vector<16x8xf32>
    %114 = arith.addf %109, %113 : vector<16x8xf32>
    %115 = arith.mulf %112, %114 : vector<16x8xf32>
    %cst_37 = arith.constant 6.000000e+00 : f32
    %116 = vector.broadcast %cst_37 : f32 to vector<16x8xf32>
    %117 = arith.addf %21, %116 : vector<16x8xf32>
    %118 = math.log %117 : vector<16x8xf32>
    %119 = tpu.reciprocal %117 {approx = true} : vector<16x8xf32> -> vector<16x8xf32>
    %120 = arith.mulf %117, %119 : vector<16x8xf32>
    %cst_38 = arith.constant 2.000000e+00 : f32
    %121 = vector.broadcast %cst_38 : f32 to vector<16x8xf32>
    %122 = arith.subf %121, %120 : vector<16x8xf32>
    %123 = arith.mulf %119, %122 : vector<16x8xf32>
    %124 = arith.mulf %123, %123 : vector<16x8xf32>
    %cst_39 = arith.constant 5.000000e-01 : f32
    %125 = vector.broadcast %cst_39 : f32 to vector<16x8xf32>
    %126 = arith.subf %117, %125 : vector<16x8xf32>
    %127 = arith.mulf %126, %118 : vector<16x8xf32>
    %128 = arith.subf %127, %117 : vector<16x8xf32>
    %cst_40 = arith.constant 0.918938517 : f32
    %129 = vector.broadcast %cst_40 : f32 to vector<16x8xf32>
    %130 = arith.addf %128, %129 : vector<16x8xf32>
    %cst_41 = arith.constant 5.95238118E-4 : f32
    %131 = vector.broadcast %cst_41 : f32 to vector<16x8xf32>
    %132 = arith.mulf %124, %131 : vector<16x8xf32>
    %cst_42 = arith.constant 7.93650805E-4 : f32
    %133 = vector.broadcast %cst_42 : f32 to vector<16x8xf32>
    %134 = arith.subf %133, %132 : vector<16x8xf32>
    %135 = arith.mulf %124, %134 : vector<16x8xf32>
    %cst_43 = arith.constant 0.00277777785 : f32
    %136 = vector.broadcast %cst_43 : f32 to vector<16x8xf32>
    %137 = arith.subf %136, %135 : vector<16x8xf32>
    %138 = arith.mulf %124, %137 : vector<16x8xf32>
    %cst_44 = arith.constant 0.0833333358 : f32
    %139 = vector.broadcast %cst_44 : f32 to vector<16x8xf32>
    %140 = arith.subf %139, %138 : vector<16x8xf32>
    %141 = arith.mulf %123, %140 : vector<16x8xf32>
    %142 = arith.addf %130, %141 : vector<16x8xf32>
    %143 = math.log %115 : vector<16x8xf32>
    %144 = arith.subf %142, %143 : vector<16x8xf32>
    %145 = tpu.concatenate %25, %23 in 0 : vector<1x8xf32>, vector<1x8xf32> -> vector<2x8xf32>
    %cst_45 = arith.constant 5.000000e+00 : f32
    %146 = vector.broadcast %cst_45 : f32 to vector<2x8xf32>
    %147 = arith.addf %145, %146 : vector<2x8xf32>
    %148 = arith.mulf %145, %147 : vector<2x8xf32>
    %cst_46 = arith.constant 4.000000e+00 : f32
    %149 = vector.broadcast %cst_46 : f32 to vector<2x8xf32>
    %150 = arith.addf %148, %149 : vector<2x8xf32>
    %151 = arith.mulf %148, %150 : vector<2x8xf32>
    %cst_47 = arith.constant 6.000000e+00 : f32
    %152 = vector.broadcast %cst_47 : f32 to vector<2x8xf32>
    %153 = arith.addf %148, %152 : vector<2x8xf32>
    %154 = arith.mulf %151, %153 : vector<2x8xf32>
    %cst_48 = arith.constant 6.000000e+00 : f32
    %155 = vector.broadcast %cst_48 : f32 to vector<2x8xf32>
    %156 = arith.addf %145, %155 : vector<2x8xf32>
    %157 = math.log %156 : vector<2x8xf32>
    %158 = tpu.reciprocal %156 {approx = true} : vector<2x8xf32> -> vector<2x8xf32>
    %159 = arith.mulf %156, %158 : vector<2x8xf32>
    %cst_49 = arith.constant 2.000000e+00 : f32
    %160 = vector.broadcast %cst_49 : f32 to vector<2x8xf32>
    %161 = arith.subf %160, %159 : vector<2x8xf32>
    %162 = arith.mulf %158, %161 : vector<2x8xf32>
    %163 = arith.mulf %162, %162 : vector<2x8xf32>
    %cst_50 = arith.constant 5.000000e-01 : f32
    %164 = vector.broadcast %cst_50 : f32 to vector<2x8xf32>
    %165 = arith.subf %156, %164 : vector<2x8xf32>
    %166 = arith.mulf %165, %157 : vector<2x8xf32>
    %167 = arith.subf %166, %156 : vector<2x8xf32>
    %cst_51 = arith.constant 0.918938517 : f32
    %168 = vector.broadcast %cst_51 : f32 to vector<2x8xf32>
    %169 = arith.addf %167, %168 : vector<2x8xf32>
    %cst_52 = arith.constant 5.95238118E-4 : f32
    %170 = vector.broadcast %cst_52 : f32 to vector<2x8xf32>
    %171 = arith.mulf %163, %170 : vector<2x8xf32>
    %cst_53 = arith.constant 7.93650805E-4 : f32
    %172 = vector.broadcast %cst_53 : f32 to vector<2x8xf32>
    %173 = arith.subf %172, %171 : vector<2x8xf32>
    %174 = arith.mulf %163, %173 : vector<2x8xf32>
    %cst_54 = arith.constant 0.00277777785 : f32
    %175 = vector.broadcast %cst_54 : f32 to vector<2x8xf32>
    %176 = arith.subf %175, %174 : vector<2x8xf32>
    %177 = arith.mulf %163, %176 : vector<2x8xf32>
    %cst_55 = arith.constant 0.0833333358 : f32
    %178 = vector.broadcast %cst_55 : f32 to vector<2x8xf32>
    %179 = arith.subf %178, %177 : vector<2x8xf32>
    %180 = arith.mulf %162, %179 : vector<2x8xf32>
    %181 = arith.addf %169, %180 : vector<2x8xf32>
    %182 = math.log %154 : vector<2x8xf32>
    %183 = arith.subf %181, %182 : vector<2x8xf32>
    %cst_56 = arith.constant 3.000000e+00 : f32
    %184 = vector.broadcast %cst_56 : f32 to vector<2x8xf32>
    %185 = arith.mulf %184, %148 : vector<2x8xf32>
    %cst_57 = arith.constant 2.000000e+01 : f32
    %186 = vector.broadcast %cst_57 : f32 to vector<2x8xf32>
    %187 = arith.addf %185, %186 : vector<2x8xf32>
    %188 = arith.mulf %187, %148 : vector<2x8xf32>
    %cst_58 = arith.constant 2.400000e+01 : f32
    %189 = vector.broadcast %cst_58 : f32 to vector<2x8xf32>
    %190 = arith.addf %188, %189 : vector<2x8xf32>
    %cst_59 = arith.constant 2.000000e+00 : f32
    %191 = vector.broadcast %cst_59 : f32 to vector<2x8xf32>
    %192 = arith.mulf %191, %145 : vector<2x8xf32>
    %cst_60 = arith.constant 5.000000e+00 : f32
    %193 = vector.broadcast %cst_60 : f32 to vector<2x8xf32>
    %194 = arith.addf %192, %193 : vector<2x8xf32>
    %195 = arith.mulf %190, %194 : vector<2x8xf32>
    %cst_61 = arith.constant 5.000000e-01 : f32
    %196 = vector.broadcast %cst_61 : f32 to vector<2x8xf32>
    %197 = arith.mulf %196, %162 : vector<2x8xf32>
    %198 = arith.subf %157, %197 : vector<2x8xf32>
    %cst_62 = arith.constant 0.0039682542 : f32
    %199 = vector.broadcast %cst_62 : f32 to vector<2x8xf32>
    %200 = arith.mulf %163, %199 : vector<2x8xf32>
    %cst_63 = arith.constant 0.00833333377 : f32
    %201 = vector.broadcast %cst_63 : f32 to vector<2x8xf32>
    %202 = arith.subf %201, %200 : vector<2x8xf32>
    %203 = arith.mulf %163, %202 : vector<2x8xf32>
    %cst_64 = arith.constant 0.0833333358 : f32
    %204 = vector.broadcast %cst_64 : f32 to vector<2x8xf32>
    %205 = arith.subf %204, %203 : vector<2x8xf32>
    %206 = arith.mulf %163, %205 : vector<2x8xf32>
    %207 = arith.subf %198, %206 : vector<2x8xf32>
    %208 = tpu.reciprocal %154 {approx = true} : vector<2x8xf32> -> vector<2x8xf32>
    %209 = arith.mulf %154, %208 : vector<2x8xf32>
    %cst_65 = arith.constant 2.000000e+00 : f32
    %210 = vector.broadcast %cst_65 : f32 to vector<2x8xf32>
    %211 = arith.subf %210, %209 : vector<2x8xf32>
    %212 = arith.mulf %208, %211 : vector<2x8xf32>
    %213 = arith.mulf %195, %212 : vector<2x8xf32>
    %214 = arith.subf %207, %213 : vector<2x8xf32>
    %215 = vector.extract_strided_slice %183 {offsets = [0, 0], sizes = [1, 8], strides = [1, 1]} : vector<2x8xf32> to vector<1x8xf32>
    %216 = vector.extract_strided_slice %183 {offsets = [1, 0], sizes = [1, 8], strides = [1, 1]} : vector<2x8xf32> to vector<1x8xf32>
    %217 = vector.extract_strided_slice %214 {offsets = [0, 0], sizes = [1, 8], strides = [1, 1]} : vector<2x8xf32> to vector<1x8xf32>
    %218 = arith.subf %215, %216 : vector<1x8xf32>
    %219 = arith.subf %144, %75 : vector<16x8xf32>
    %cst_66 = arith.constant dense<0.000000e+00> : vector<8xf32>
    %220 = vector.multi_reduction <add>, %219, %cst_66 [0] : vector<16x8xf32> to vector<8xf32>
    %221 = vector.shape_cast %220 : vector<8xf32> to vector<1x8xf32>
    %222 = arith.addf %218, %221 : vector<1x8xf32>
    %223 = arith.subf %17, %21 : vector<16x8xf32>
    %224 = vector.broadcast %217 : vector<1x8xf32> to vector<16x8xf32>
    %225 = arith.subf %106, %224 : vector<16x8xf32>
    %226 = arith.mulf %223, %225 : vector<16x8xf32>
    %cst_67 = arith.constant dense<0.000000e+00> : vector<8xf32>
    %227 = vector.multi_reduction <add>, %226, %cst_67 [0] : vector<16x8xf32> to vector<8xf32>
    %228 = vector.shape_cast %227 : vector<8xf32> to vector<1x8xf32>
    %229 = arith.addf %222, %228 : vector<1x8xf32>
    %c0_68 = arith.constant 0 : index
    %c0_69 = arith.constant 0 : index
    %230 = vector.load %arg5[%c0_68, %c0_69] : memref<1x8xf32, #tpu.memory_space<vmem>>, vector<1x8xf32>
    %231 = arith.mulf %229, %37 : vector<1x8xf32>
    %cst_70 = arith.constant 0.000000e+00 : f32
    %232 = vector.broadcast %cst_70 : f32 to vector<1x8xf32>
    %233 = arith.select %13, %231, %232 : vector<1x8xi1>, vector<1x8xf32>
    %234 = arith.addf %230, %233 : vector<1x8xf32>
    %c0_71 = arith.constant 0 : index
    %c0_72 = arith.constant 0 : index
    %235 = vector.load %arg5[%c0_71, %c0_72] : memref<1x8xf32, #tpu.memory_space<vmem>>, vector<1x8xf32>
    tpu.vector_store %arg5[%c0_71, %c0_72], %234 {strides = array<i32>} : memref<1x8xf32, #tpu.memory_space<vmem>>, vector<1x8xf32>,
    return
  }
  func.func @transform_0(%arg0: i32, %arg1: i32) -> (i32, i32) {
    %c1_i32 = arith.constant 1 : i32
    %0 = arith.muli %arg0, %c1_i32 : i32
    %1 = arith.addi %0, %arg1 : i32
    %c0_i32 = arith.constant 0 : i32
    %c0_i32_0 = arith.constant 0 : i32
    return %c0_i32, %1 : i32, i32
  }
  func.func @transform_1(%arg0: i32, %arg1: i32) -> (i32, i32) {
    %c1_i32 = arith.constant 1 : i32
    %0 = arith.muli %arg0, %c1_i32 : i32
    %1 = arith.addi %0, %arg1 : i32
    %c0_i32 = arith.constant 0 : i32
    %c0_i32_0 = arith.constant 0 : i32
    return %c0_i32, %1 : i32, i32
  }
  func.func @transform_2(%arg0: i32, %arg1: i32) -> (i32, i32) {
    %c0_i32 = arith.constant 0 : i32
    %c0_i32_0 = arith.constant 0 : i32
    %c0_i32_1 = arith.constant 0 : i32
    return %c0_i32, %c0_i32_0 : i32, i32
  }
  func.func @transform_3(%arg0: i32, %arg1: i32) -> (i32, i32) {
    %c0_i32 = arith.constant 0 : i32
    %c0_i32_0 = arith.constant 0 : i32
    return %c0_i32, %arg0 : i32, i32
  }
}

</mosaic_0001>

<bundles_post_ra>
// kernel: tpu_custom_call.1
= control target key start
LH: loop header
LB: loop body
LE: loop exit
PB: predicated region body
PF: predicated region fallthrough
CT: control target
= control target key end

     0   :  { %v533_v2 = vmov 0   ;;  %s785_s0 = inlined_call_operand.vmem [shape: f32[8,16], index: 0, kind: input, shape index: {}]   ;;  %s786_s1 = inlined_call_operand.vmem [shape: f32[8,16], index: 1, kind: input, shape index: {}]   ;;  %s787_s2 = inlined_call_operand.vmem [shape: f32[16,1], index: 2, kind: input, shape index: {}]   ;;  %s788_s3 = inlined_call_operand.hbm [shape: f32[1,8], index: 3, kind: output, shape index: {}]  }
   0x1   :  { %v55_v0 = vld [vmem:[%s785_s0] sm:$0xff]  ;;  %467 = vset.pattern.permute.xlu1 %v533_v2 }
   0x2   :  { %v121_v1 = vld [vmem:[%s787_s2] sm:$0xff]  ;;  %56 = vxpose.xlu0.b32.start.end [1/1] (short) (narrow) %v55_v0, 16 }
   0x3   :  { %8 = vsyncpa [#allocation3], 0  ;;  %157 = vperm.xlu1 %467, %v121_v1   ;;  %v122_v3 = vld [vmem:[%s787_s2 + $0x8] sm:$0xff]  ;;  %v88_v4 = vld [vmem:[%s786_s1] sm:$0xff]  ;;  %v125_v5 = vlaneseq  ;;  %vm136_vm1 = vcmask 64512   ;;  %vm340_vm2 = vcmask 1040384  }
   0x4   :  { %vm53_vm3 = vcmask 57344   ;;  %s535_s0 = smov [#allocation2]   ;;  %s438_s21 = sshll.u32 %s788_s3, 4  ;;  %s439_s21 = int_to_ptr.hbm [resolvable:$true] %s438_s21 }
   0x5   :  { %v568_v6 = vand.u32 127, %v125_v5  ;;  %s436_s1 = sshll.u32 %s535_s0, 4  ;;  %s437_s1 = int_to_ptr.vmem [resolvable:$true] %s436_s1 }
   0x7   :  { %vm129_vm0 = vcmp.lt.s32.totalorder %v568_v6, 8 }
   0xb   :  { %162 = vperm.xlu1 %467, %v122_v3  }
  0x12   :  { %89 = vxpose.xlu0.b32.start.end [1/1] (short) (narrow) %v88_v4, 16 }
  0x79   :  { %468 = vset.pattern.permute.xlu0 %v533_v2 }
  0xa6   :  { %v72_v7 = vpop.trf.xlu0 }
  0xa7   :  { %v573_v8 = vsel %vm129_vm0, %v72_v7, 1.0 }
  0xa8   :  { %v576_v9 = vadd.f32 6.0, %v573_v8  ;;  %v182_v13 = vadd.f32 5.0, %v573_v8  ;;  %v146_v21 = vsel %vm136_vm1, %v573_v8, 0.0  ;;  %v248_v35 = vmul.f32 2.0, %v573_v8 }
  0xaa   :  { %469 = vrcp.f32 %v576_v9  ;;  %v184_v15 = vmul.f32 %v182_v13, %v573_v8  ;;  %v459_v45 = vadd.f32 -0.5, %v576_v9  ;;  %v250_v46 = vadd.f32 5.0, %v248_v35 }
  0xac   :  { %v186_v22 = vadd.f32 4.0, %v184_v15  ;;  %v240_v23 = vmul.f32 3.0, %v184_v15  ;;  %v190_v33 = vadd.f32 6.0, %v184_v15 }
  0xae   :  { %v73_v10 = vpop.trf.xlu0  ;;  %v188_v28 = vmul.f32 %v186_v22, %v184_v15  ;;  %v242_v29 = vadd.f32 20.0, %v240_v23 }
  0xaf   :  { %v580_v11 = vsel %vm129_vm0, %v73_v10, 1.0 }
  0xb0   :  { %v584_v12 = vadd.f32 6.0, %v580_v11  ;;  %v470_v14 = vpop.eup %469  ;;  %v147_v18 = vsel %vm136_vm1, %v580_v11, 0.0  ;;  %v183_v36 = vadd.f32 5.0, %v580_v11  ;;  %v608_v37 = vmul.f32 %v190_v33, %v188_v28 }
  0xb1   :  { %v202_v17 = vmul.f32 %v470_v14, %v576_v9  ;;  %v148_v25 = vadd.f32 %v147_v18, %v146_v21  ;;  %v244_v38 = vmul.f32 %v242_v29, %v184_v15  ;;  %v249_v50 = vmul.f32 2.0, %v580_v11 }
  0xb2   :  { %471 = vrcp.f32 %v584_v12  ;;  %v185_v47 = vmul.f32 %v183_v36, %v580_v11  ;;  %v645_v0 = vadd.f32 -0.5, %v584_v12 }
  0xb3   :  { %473 = vlog2.f32 %v576_v9  ;;  %v204_v24 = vsub.f32 2.0, %v202_v17  ;;  %v149_v31 = vrot.slane %v148_v25, 4  ;;  %v246_v49 = vadd.f32 24.0, %v244_v38 }
  0xb4   :  { %v187_v60 = vadd.f32 4.0, %v185_v47  ;;  %v241_v1 = vmul.f32 3.0, %v185_v47  ;;  %v663_v29 = vadd.f32 5.0, %v249_v50 }
  0xb5   :  { %v603_v30 = vmul.f32 %v470_v14, %v204_v24  ;;  %v150_v42 = vadd.f32 %v149_v31, %v148_v25  ;;  %v642_v63 = vmul.f32 %v250_v46, %v246_v49 }
  0xb6   :  { %v105_v16 = vpop.trf.xlu0 }
  0xb7   :  { %v594_v20 = vsel %vm129_vm0, %v105_v16, 1.0  ;;  %v614_v41 = vmul.f32 %v603_v30, %v603_v30  ;;  %v151_v54 = vrot.slane %v150_v42, 2  ;;  %v189_v16 = vmul.f32 %v187_v60, %v185_v47 }
  0xb8   :  { %v472_v19 = vpop.eup %471  ;;  %v601_v27 = vadd.f32 6.0, %v594_v20  ;;  %v282_v55 = vadd.f32 5.0, %v594_v20  ;;  %v137_v57 = vsel %vm136_vm1, %v594_v20, 0.0  ;;  %v666_v33 = vmul.f32 0.5, %v603_v30 }
  0xb9   :  { %v203_v26 = vmul.f32 %v472_v19, %v584_v12  ;;  %v474_v32 = vpop.eup %473  ;;  %v218_v53 = vmul.f32 0.0005952381, %v614_v41  ;;  %v152_v13 = vadd.f32 %v151_v54, %v150_v42 }
  0xba   :  { %475 = vrcp.f32 %v601_v27  ;;  %v610_v40 = vmul.f32 0.6931472, %v474_v32  ;;  %v284_v5 = vmul.f32 %v282_v55, %v594_v20 }
  0xbb   :  { %v205_v34 = vsub.f32 2.0, %v203_v26  ;;  %477 = vlog2.f32 %v608_v37  ;;  %v220_v4 = vsub.f32 0.0007936508, %v218_v53  ;;  %v153_v28 = vrot.slane %v152_v13, 1 }
  0xbc   :  { %v212_v52 = vmul.f32 %v459_v45, %v610_v40  ;;  %479 = vrcp.f32 %v608_v37  ;;  %v286_v25 = vadd.f32 4.0, %v284_v5  ;;  %v256_v60 = vsub.f32 %v610_v40, %v666_v33 }
  0xbd   :  { %v616_v43 = vmul.f32 %v472_v19, %v205_v34  ;;  %481 = vlog2.f32 %v584_v12  ;;  %v243_v19 = vadd.f32 20.0, %v241_v1  ;;  %v222_v24 = vmul.f32 %v220_v4, %v614_v41 }
  0xbe   :  { %v106_v39 = vpop.trf.xlu0  ;;  %v214_v3 = vsub.f32 %v212_v52, %v576_v9  ;;  %v191_v9 = vadd.f32 6.0, %v185_v47  ;;  %v288_v50 = vmul.f32 %v286_v25, %v284_v5  ;;  %v154_v53 = vadd.f32 %v153_v28, %v152_v13 }
  0xbf   :  { %v622_v48 = vsel %vm129_vm0, %v106_v39, 1.0  ;;  %v632_v56 = vmul.f32 %v616_v43, %v616_v43  ;;  %v258_v39 = vmul.f32 0.003968254, %v614_v41  ;;  %v672_v42 = vmul.f32 %v243_v19, %v185_v47 }
  0xc0   :  { %v476_v44 = vpop.eup %475  ;;  %v138_v59 = vsel %vm136_vm1, %v622_v48, 0.0  ;;  %v640_v62 = vadd.f32 6.0, %v622_v48  ;;  %v283_v18 = vadd.f32 5.0, %v622_v48  ;;  %v660_v23 = vadd.f32 0.9189385, %v214_v3 }
  0xc1   :  { %v302_v51 = vmul.f32 %v476_v44, %v601_v27  ;;  %v139_v61 = vadd.f32 %v138_v59, %v137_v57  ;;  %v478_v10 = vpop.eup %477  ;;  %v219_v15 = vmul.f32 0.0005952381, %v632_v56  ;;  %v668_v34 = vmul.f32 %v191_v9, %v189_v16 }
  0xc2   :  { %483 = vrcp.f32 %v640_v62  ;;  %v658_v22 = vpop.eup %479  ;;  %v285_v36 = vmul.f32 %v283_v18, %v622_v48  ;;  %v224_v49 = vsub.f32 0.0027777778, %v222_v24  ;;  %v290_v57 = vadd.f32 6.0, %v284_v5 }
  0xc3   :  { %v304_v58 = vsub.f32 2.0, %v302_v51  ;;  %v140_v7 = vrot.slane %v139_v61, 4  ;;  %485 = vlog2.f32 %v601_v27  ;;  %v221_v32 = vsub.f32 0.0007936508, %v219_v15  ;;  %v482_v38 = vpop.eup %481 }
  0xc4   :  { %487 = vlog2.f32 %v640_v62  ;;  %v287_v59 = vadd.f32 4.0, %v285_v36  ;;  %v272_v1 = vmul.f32 %v658_v22, %v608_v37  ;;  %v226_v4 = vmul.f32 %v224_v49, %v614_v41 }
  0xc5   :  { %v647_v2 = vmul.f32 %v476_v44, %v304_v58  ;;  %v141_v17 = vadd.f32 %v140_v7, %v139_v61  ;;  %v674_v44 = vmul.f32 0.6931472, %v478_v10  ;;  %v223_v54 = vmul.f32 %v221_v32, %v632_v56  ;;  %v158_v32 = vpop.permute.xlu1 %157 }
  0xc6   :  { %v260_v61 = vsub.f32 0.008333334, %v258_v39  ;;  %v292_v7 = vmul.f32 %v290_v57, %v288_v50  ;;  %v461_v5 = vadd.f32 -0.5, %v601_v27  ;;  %v693_v19 = vmul.f32 0.6931472, %v482_v38 }
  0xc7   :  { %v308_v14 = vmul.f32 %v647_v2, %v647_v2  ;;  %v142_v26 = vrot.slane %v141_v17, 2  ;;  %v225_v15 = vsub.f32 0.0027777778, %v223_v54  ;;  %v289_v37 = vmul.f32 %v287_v59, %v285_v36 }
  0xc8   :  { %v484_v46 = vpop.eup %483  ;;  %v262_v24 = vmul.f32 %v260_v61, %v614_v41  ;;  %489 = vlog2.f32 %v668_v34  ;;  %v228_v28 = vsub.f32 0.083333336, %v226_v4  ;;  %v213_v49 = vmul.f32 %v645_v0, %v693_v19 }
  0xc9   :  { %v318_v21 = vmul.f32 0.0005952381, %v308_v14  ;;  %v143_v35 = vadd.f32 %v142_v26, %v141_v17  ;;  %v486_v52 = vpop.eup %485  ;;  %v303_v55 = vmul.f32 %v484_v46, %v640_v62  ;;  %491 = vlog2.f32 %v292_v7 }
  0xca   :  { %v297_v10 = vmul.f32 0.6931472, %v486_v52  ;;  %v488_v18 = vpop.eup %487  ;;  %v264_v54 = vsub.f32 0.083333336, %v262_v24  ;;  %v230_v7 = vmul.f32 %v228_v28, %v603_v30  ;;  %v165_v30 = vmul.f32 %v158_v32, %v594_v20 }
  0xcb   :  { %v320_v31 = vsub.f32 0.0007936508, %v318_v21  ;;  %v144_v51 = vrot.slane %v143_v35, 1  ;;  %v305_v3 = vsub.f32 2.0, %v303_v55  ;;  %v299_v38 = vmul.f32 0.6931472, %v488_v18 }
  0xcc   :  { %v274_v55 = vsub.f32 2.0, %v272_v1  ;;  %v721_v1 = vadd.f32 24.0, %v672_v42 }
  0xcd   :  { %v322_v45 = vmul.f32 %v320_v31, %v308_v14  ;;  %v679_v47 = vadd.f32 %v144_v51, %v143_v35  ;;  %v690_v16 = vmul.f32 %v484_v46, %v305_v3  ;;  %v312_v31 = vmul.f32 %v461_v5, %v297_v10 }
  0xce   :  { %v227_v35 = vmul.f32 %v225_v15, %v632_v56  ;;  %v462_v51 = vadd.f32 -0.5, %v640_v62  ;;  %v259_v5 = vmul.f32 0.003968254, %v632_v56  ;;  %v215_v15 = vsub.f32 %v213_v49, %v584_v12 }
  0xcf   :  { %v324_v58 = vsub.f32 0.0027777778, %v322_v45  ;;  %v687_v13 = vsel %vm340_vm2, %v154_v53, %v679_v47  ;;  %v309_v25 = vmul.f32 %v690_v16, %v690_v16  ;;  %v314_v57 = vsub.f32 %v312_v31, %v601_v27 }
  0xd0   :  { %v342_v17 = vadd.f32 5.0, %v687_v13  ;;  %v696_v21 = vadd.f32 6.0, %v687_v13  ;;  %v229_v59 = vsub.f32 0.083333336, %v227_v35  ;;  %v313_v61 = vmul.f32 %v462_v51, %v299_v38 }
  0xd1   :  { %v326_v9 = vmul.f32 %v324_v58, %v308_v14  ;;  %v291_v14 = vadd.f32 6.0, %v285_v36  ;;  %v319_v39 = vmul.f32 0.0005952381, %v309_v25  ;;  %v490_v58 = vpop.eup %489  ;;  %v726_v18 = vmul.f32 %v658_v22, %v274_v55 }
  0xd2   :  { %v703_v26 = vmul.f32 %v342_v17, %v687_v13  ;;  %493 = vrcp.f32 %v696_v21  ;;  %v492_v4 = vpop.eup %491  ;;  %v315_v24 = vsub.f32 %v313_v61, %v640_v62  ;;  %v232_v31 = vadd.f32 %v230_v7, %v660_v23 }
  0xd3   :  { %v328_v46 = vsub.f32 0.083333336, %v326_v9  ;;  %v293_v50 = vmul.f32 %v291_v14, %v289_v37  ;;  %v321_v52 = vsub.f32 0.0007936508, %v319_v39  ;;  %495 = vrcp.f32 %v668_v34 }
  0xd4   :  { %v344_v45 = vadd.f32 4.0, %v703_v26  ;;  %v346_v36 = vadd.f32 6.0, %v703_v26  ;;  %v316_v9 = vadd.f32 0.9189385, %v314_v57  ;;  %v231_v37 = vmul.f32 %v229_v59, %v616_v43 }
  0xd5   :  { %v323_v0 = vmul.f32 %v321_v52, %v309_v25  ;;  %v330_v10 = vmul.f32 %v328_v46, %v647_v2  ;;  %497 = vlog2.f32 %v293_v50  ;;  %v371_v2 = vmul.f32 3.0, %v703_v26 }
  0xd6   :  { %v345_v53 = vmul.f32 %v344_v45, %v703_v26  ;;  %v735_v14 = vmul.f32 %v264_v54, %v614_v41  ;;  %v261_v35 = vsub.f32 0.008333334, %v259_v5  ;;  %v217_v38 = vadd.f32 0.9189385, %v215_v15  ;;  %v163_v45 = vpop.permute.xlu1 %162 }
  0xd7   :  { %v325_v27 = vsub.f32 0.0027777778, %v323_v0  ;;  %v332_v22 = vadd.f32 %v330_v10, %v316_v9  ;;  %v335_v49 = vmul.f32 0.6931472, %v492_v4  ;;  %v372_v62 = vadd.f32 20.0, %v371_v2 }
  0xd8   :  { %v715_v3 = vmul.f32 %v346_v36, %v345_v53  ;;  %v494_v17 = vpop.eup %493  ;;  %v233_v50 = vadd.f32 %v231_v37, %v217_v38  ;;  %v317_v51 = vadd.f32 0.9189385, %v315_v24  ;;  %v534_v41 = vmov 0.0  }
  0xd9   :  { %v327_v42 = vmul.f32 %v325_v27, %v309_v25  ;;  %v352_v28 = vmul.f32 %v494_v17, %v696_v21  ;;  %v496_v12 = vpop.eup %495  ;;  %54 = vst.msk [vmem:[#allocation2] sm:$0x1] %vm53_vm3, %v534_v41  ;;  %v338_v53 = vsub.f32 %v332_v22, %v335_v49  ;;  %v237_v36 = vmul.f32 0.6931472, %v490_v58 }
  0xda   :  { %499 = vrcp.f32 %v715_v3  ;;  %v263_v54 = vmul.f32 %v261_v35, %v632_v56  ;;  %v166_v55 = vmul.f32 %v163_v45, %v622_v48  ;;  %v238_v4 = vsub.f32 %v232_v31, %v674_v44 }
  0xdb   :  { %v329_v39 = vsub.f32 0.083333336, %v327_v42  ;;  %501 = vlog2.f32 %v696_v21  ;;  %v353_v32 = vsub.f32 2.0, %v352_v28  ;;  %v498_v46 = vpop.eup %497  ;;  %v167_v7 = vsel %vm136_vm1, %v165_v30, 0.0 }
  0xdc   :  { %v337_v59 = vmul.f32 0.6931472, %v498_v46  ;;  %v373_v10 = vmul.f32 %v372_v62, %v703_v26  ;;  %v239_v5 = vsub.f32 %v233_v50, %v237_v36  ;;  %v396_v9 = vsub.f32 %v338_v53, %v238_v4 }
  0xdd   :  { %v331_v23 = vmul.f32 %v329_v39, %v690_v16  ;;  %v739_v52 = vmul.f32 %v494_v17, %v353_v32  ;;  %v273_v16 = vmul.f32 %v496_v12, %v668_v34  ;;  %v265_v2 = vsub.f32 0.083333336, %v263_v54 }
  0xde   :  { %v375_v37 = vmul.f32 2.0, %v687_v13  ;;  %v168_v24 = vsel %vm136_vm1, %v166_v55, 0.0  ;;  %v255_v30 = vmul.f32 0.5, %v616_v43  ;;  %v374_v26 = vadd.f32 24.0, %v373_v10 }
  0xdf   :  { %v333_v57 = vadd.f32 %v331_v23, %v317_v51  ;;  %v355_v61 = vmul.f32 %v739_v52, %v739_v52  ;;  %v275_v44 = vsub.f32 2.0, %v273_v16  ;;  %v378_v35 = vmul.f32 0.5, %v739_v52 }
  0xe0   :  { %v500_v25 = vpop.eup %499  ;;  %v267_v45 = vmul.f32 %v265_v2, %v632_v56  ;;  %v463_v13 = vadd.f32 -0.5, %v696_v21  ;;  %v376_v46 = vadd.f32 5.0, %v375_v37  ;;  %v169_v49 = vadd.f32 %v168_v24, %v167_v7 }
  0xe1   :  { %v387_v0 = vmul.f32 %v500_v25, %v715_v3  ;;  %v502_v58 = vpop.eup %501  ;;  %v339_v15 = vsub.f32 %v333_v57, %v337_v59  ;;  %v380_v27 = vmul.f32 0.003968254, %v355_v61  ;;  %v360_v17 = vmul.f32 0.0005952381, %v355_v61 }
  0xe2   :  { %v350_v31 = vmul.f32 0.6931472, %v502_v58  ;;  %v398_v62 = vsel %vm136_vm1, %v396_v9, 0.0  ;;  %v277_v43 = vmul.f32 %v496_v12, %v275_v44  ;;  %v257_v41 = vsub.f32 %v693_v19, %v255_v30 }
  0xe3   :  { %v381_v42 = vsub.f32 0.008333334, %v380_v27  ;;  %v388_v28 = vsub.f32 2.0, %v387_v0  ;;  %v397_v34 = vsub.f32 %v339_v15, %v239_v5  ;;  %v361_v22 = vsub.f32 0.0007936508, %v360_v17 }
  0xe4   :  { %v357_v53 = vmul.f32 %v463_v13, %v350_v31  ;;  %v377_v54 = vmul.f32 %v376_v46, %v374_v26  ;;  %v379_v55 = vsub.f32 %v350_v31, %v378_v35  ;;  %v268_v56 = vsub.f32 %v256_v60, %v735_v14 }
  0xe5   :  { %v382_v38 = vmul.f32 %v381_v42, %v355_v61  ;;  %v399_v39 = vsel %vm136_vm1, %v397_v34, 0.0  ;;  %v362_v32 = vmul.f32 %v361_v22, %v355_v61  ;;  %v389_v51 = vmul.f32 %v500_v25, %v388_v28 }
  0xe6   :  { %v400_v36 = vadd.f32 %v399_v39, %v398_v62  ;;  %v253_v0 = vmul.f32 %v663_v29, %v721_v1  ;;  %v269_v16 = vsub.f32 %v257_v41, %v267_v45  ;;  %v170_v25 = vrot.slane %v169_v49, 4 }
  0xe7   :  { %v383_v50 = vsub.f32 0.083333336, %v382_v38  ;;  %v363_v23 = vsub.f32 0.0027777778, %v362_v32  ;;  %v390_v12 = vmul.f32 %v389_v51, %v377_v54  ;;  %503 = vlog2.f32 %v715_v3 }
  0xe8   :  { %v358_v19 = vsub.f32 %v357_v53, %v696_v21  ;;  %v401_v10 = vrot.slane %v400_v36, 4  ;;  %v279_v58 = vmul.f32 %v277_v43, %v253_v0  ;;  %v171_v40 = vadd.f32 %v170_v25, %v169_v49  ;;  %v425_v53 = vld [vmem:[#allocation2] sm:$0x1] }
  0xe9   :  { %v384_v57 = vmul.f32 %v383_v50, %v355_v61  ;;  %v364_v59 = vmul.f32 %v363_v23, %v355_v61  ;;  %v278_v61 = vmul.f32 %v726_v18, %v642_v63  ;;  %505 = vrcp.f32 %v679_v47 }
  0xea   :  { %v281_v29 = vsub.f32 %v269_v16, %v279_v58  ;;  %v359_v14 = vadd.f32 0.9189385, %v358_v19  ;;  %v402_v15 = vadd.f32 %v401_v10, %v400_v36  ;;  %v408_v21 = vsub.f32 %v573_v8, %v594_v20 }
  0xeb   :  { %v385_v4 = vsub.f32 %v379_v55, %v384_v57  ;;  %v365_v7 = vsub.f32 0.083333336, %v364_v59  ;;  %v280_v60 = vsub.f32 %v268_v56, %v278_v61  ;;  %v409_v3 = vsub.f32 %v580_v11, %v622_v48 }
  0xec   :  { %v172_v17 = vrot.slane %v171_v40, 2  ;;  %v403_v24 = vrot.slane %v402_v15, 2 }
  0xed   :  { %v391_v5 = vsub.f32 %v385_v4, %v390_v12  ;;  %v366_v33 = vmul.f32 %v365_v7, %v739_v52  ;;  %v504_v27 = vpop.eup %503 }
  0xee   :  { %v369_v37 = vmul.f32 0.6931472, %v504_v27  ;;  %v173_v44 = vadd.f32 %v172_v17, %v171_v40  ;;  %v404_v11 = vadd.f32 %v403_v24, %v402_v15 }
  0xef   :  { %v410_v1 = vperm.slane %v391_v5, 0  ;;  %v367_v9 = vadd.f32 %v366_v33, %v359_v14  ;;  %v506_v42 = vpop.eup %505 }
  0xf0   :  { %v178_v20 = vmul.f32 %v506_v42, %v679_v47  ;;  %v174_v31 = vrot.slane %v173_v44, 1  ;;  %v405_v39 = vrot.slane %v404_v11, 1 }
  0xf1   :  { %v411_v63 = vsub.f32 %v280_v60, %v410_v1  ;;  %v412_v18 = vsub.f32 %v281_v29, %v410_v1  ;;  %v370_v30 = vsub.f32 %v367_v9, %v369_v37 }
  0xf2   :  { %v179_v38 = vsub.f32 2.0, %v178_v20  ;;  %v175_v32 = vadd.f32 %v174_v31, %v173_v44  ;;  %v406_v49 = vadd.f32 %v405_v39, %v404_v11 }
  0xf3   :  { %v413_v2 = vmul.f32 %v411_v63, %v408_v21  ;;  %v414_v52 = vmul.f32 %v412_v18, %v409_v3  ;;  %v393_v26 = vrot.slane %v370_v30, 1 }
  0xf4   :  { %v180_v46 = vmul.f32 %v506_v42, %v179_v38  ;;  %v176_v50 = vmul.f32 16.0, %v175_v32 }
  0xf5   :  { %v415_v28 = vsel %vm136_vm1, %v413_v2, 0.0  ;;  %v416_v34 = vsel %vm136_vm1, %v414_v52, 0.0  ;;  %v395_v45 = vsub.f32 %v370_v30, %v393_v26 }
  0xf6   :  { %v417_v22 = vadd.f32 %v416_v34, %v415_v28  ;;  %v181_v43 = vmul.f32 %v180_v46, %v176_v50 }
  0xf7   :  { %v407_v51 = vadd.f32 %v406_v49, %v395_v45 }
  0xf8   :  { %v418_v8 = vrot.slane %v417_v22, 4 }
  0xfa   :  { %v419_v48 = vadd.f32 %v418_v8, %v417_v22 }
  0xfc   :  { %v420_v35 = vrot.slane %v419_v48, 2 }
  0xfe   :  { %v421_v13 = vadd.f32 %v420_v35, %v419_v48 }
 0x100   :  { %v422_v62 = vrot.slane %v421_v13, 1 }
 0x102   :  { %v423_v23 = vadd.f32 %v422_v62, %v421_v13 }
 0x104   :  { %v424_v41 = vadd.f32 %v423_v23, %v407_v51 }
 0x106   :  { %v426_v47 = vmul.f32 %v424_v41, %v181_v43 }
 0x108   :  { %v427_v36 = vsel %vm129_vm0, %v426_v47, 0.0 }
 0x109   :  { %v428_v54 = vadd.f32 %v427_v36, %v425_v53 }
 0x10b   :  { %430 = vst.msk [vmem:[#allocation2] sm:$0x1] %vm53_vm3, %v428_v54 }
 0x10c   :  { %441 = dma.vmem_to_hbm [thread:$0]  %s437_s1, 16, %s439_s21, [#allocation3]  }
 0x10d   :  { %531 = dma.done.wait [#allocation3], 16  }
 0x10e   :  { %532 = vsyncadd [#allocation3], 4294967280 }
 0x10f   :  { %446 = vsyncpa [#allocation3], 1 }

// kernel: tpu_custom_call.1
= control target key start
LH: loop header
LB: loop body
LE: loop exit
PB: predicated region body
PF: predicated region fallthrough
CT: control target
= control target key end

     0   :  { %v533_v2 = vmov 0   ;;  %s785_s0 = inlined_call_operand.vmem [shape: f32[8,16], index: 0, kind: input, shape index: {}]   ;;  %s786_s1 = inlined_call_operand.vmem [shape: f32[8,16], index: 1, kind: input, shape index: {}]   ;;  %s787_s2 = inlined_call_operand.vmem [shape: f32[16,1], index: 2, kind: input, shape index: {}]   ;;  %s788_s3 = inlined_call_operand.hbm [shape: f32[1,8], index: 3, kind: output, shape index: {}]  }
   0x1   :  { %v55_v0 = vld [vmem:[%s785_s0] sm:$0xff]  ;;  %467 = vset.pattern.permute.xlu1 %v533_v2 }
   0x2   :  { %v121_v1 = vld [vmem:[%s787_s2] sm:$0xff]  ;;  %56 = vxpose.xlu0.b32.start.end [1/1] (short) (narrow) %v55_v0, 16 }
   0x3   :  { %8 = vsyncpa [#allocation3], 0  ;;  %157 = vperm.xlu1 %467, %v121_v1   ;;  %v122_v3 = vld [vmem:[%s787_s2 + $0x8] sm:$0xff]  ;;  %v88_v4 = vld [vmem:[%s786_s1] sm:$0xff]  ;;  %v125_v5 = vlaneseq  ;;  %vm136_vm1 = vcmask 64512   ;;  %vm340_vm2 = vcmask 1040384  }
   0x4   :  { %vm53_vm3 = vcmask 57344   ;;  %s535_s0 = smov [#allocation2]   ;;  %s438_s21 = sshll.u32 %s788_s3, 4  ;;  %s439_s21 = int_to_ptr.hbm [resolvable:$true] %s438_s21 }
   0x5   :  { %v568_v6 = vand.u32 127, %v125_v5  ;;  %s436_s1 = sshll.u32 %s535_s0, 4  ;;  %s437_s1 = int_to_ptr.vmem [resolvable:$true] %s436_s1 }
   0x7   :  { %vm129_vm0 = vcmp.lt.s32.totalorder %v568_v6, 8 }
   0xb   :  { %162 = vperm.xlu1 %467, %v122_v3  }
  0x12   :  { %89 = vxpose.xlu0.b32.start.end [1/1] (short) (narrow) %v88_v4, 16 }
  0x79   :  { %468 = vset.pattern.permute.xlu0 %v533_v2 }
  0xa6   :  { %v72_v7 = vpop.trf.xlu0 }
  0xa7   :  { %v573_v8 = vsel %vm129_vm0, %v72_v7, 1.0 }
  0xa8   :  { %v576_v9 = vadd.f32 6.0, %v573_v8  ;;  %v182_v13 = vadd.f32 5.0, %v573_v8  ;;  %v146_v21 = vsel %vm136_vm1, %v573_v8, 0.0  ;;  %v248_v35 = vmul.f32 2.0, %v573_v8 }
  0xaa   :  { %469 = vrcp.f32 %v576_v9  ;;  %v184_v15 = vmul.f32 %v182_v13, %v573_v8  ;;  %v459_v45 = vadd.f32 -0.5, %v576_v9  ;;  %v250_v46 = vadd.f32 5.0, %v248_v35 }
  0xac   :  { %v186_v22 = vadd.f32 4.0, %v184_v15  ;;  %v240_v23 = vmul.f32 3.0, %v184_v15  ;;  %v190_v33 = vadd.f32 6.0, %v184_v15 }
  0xae   :  { %v73_v10 = vpop.trf.xlu0  ;;  %v188_v28 = vmul.f32 %v186_v22, %v184_v15  ;;  %v242_v29 = vadd.f32 20.0, %v240_v23 }
  0xaf   :  { %v580_v11 = vsel %vm129_vm0, %v73_v10, 1.0 }
  0xb0   :  { %v584_v12 = vadd.f32 6.0, %v580_v11  ;;  %v470_v14 = vpop.eup %469  ;;  %v147_v18 = vsel %vm136_vm1, %v580_v11, 0.0  ;;  %v183_v36 = vadd.f32 5.0, %v580_v11  ;;  %v608_v37 = vmul.f32 %v190_v33, %v188_v28 }
  0xb1   :  { %v202_v17 = vmul.f32 %v470_v14, %v576_v9  ;;  %v148_v25 = vadd.f32 %v147_v18, %v146_v21  ;;  %v244_v38 = vmul.f32 %v242_v29, %v184_v15  ;;  %v249_v50 = vmul.f32 2.0, %v580_v11 }
  0xb2   :  { %471 = vrcp.f32 %v584_v12  ;;  %v185_v47 = vmul.f32 %v183_v36, %v580_v11  ;;  %v645_v0 = vadd.f32 -0.5, %v584_v12 }
  0xb3   :  { %473 = vlog2.f32 %v576_v9  ;;  %v204_v24 = vsub.f32 2.0, %v202_v17  ;;  %v149_v31 = vrot.slane %v148_v25, 4  ;;  %v246_v49 = vadd.f32 24.0, %v244_v38 }
  0xb4   :  { %v187_v60 = vadd.f32 4.0, %v185_v47  ;;  %v241_v1 = vmul.f32 3.0, %v185_v47  ;;  %v663_v29 = vadd.f32 5.0, %v249_v50 }
  0xb5   :  { %v603_v30 = vmul.f32 %v470_v14, %v204_v24  ;;  %v150_v42 = vadd.f32 %v149_v31, %v148_v25  ;;  %v642_v63 = vmul.f32 %v250_v46, %v246_v49 }
  0xb6   :  { %v105_v16 = vpop.trf.xlu0 }
  0xb7   :  { %v594_v20 = vsel %vm129_vm0, %v105_v16, 1.0  ;;  %v614_v41 = vmul.f32 %v603_v30, %v603_v30  ;;  %v151_v54 = vrot.slane %v150_v42, 2  ;;  %v189_v16 = vmul.f32 %v187_v60, %v185_v47 }
  0xb8   :  { %v472_v19 = vpop.eup %471  ;;  %v601_v27 = vadd.f32 6.0, %v594_v20  ;;  %v282_v55 = vadd.f32 5.0, %v594_v20  ;;  %v137_v57 = vsel %vm136_vm1, %v594_v20, 0.0  ;;  %v666_v33 = vmul.f32 0.5, %v603_v30 }
  0xb9   :  { %v203_v26 = vmul.f32 %v472_v19, %v584_v12  ;;  %v474_v32 = vpop.eup %473  ;;  %v218_v53 = vmul.f32 0.0005952381, %v614_v41  ;;  %v152_v13 = vadd.f32 %v151_v54, %v150_v42 }
  0xba   :  { %475 = vrcp.f32 %v601_v27  ;;  %v610_v40 = vmul.f32 0.6931472, %v474_v32  ;;  %v284_v5 = vmul.f32 %v282_v55, %v594_v20 }
  0xbb   :  { %v205_v34 = vsub.f32 2.0, %v203_v26  ;;  %477 = vlog2.f32 %v608_v37  ;;  %v220_v4 = vsub.f32 0.0007936508, %v218_v53  ;;  %v153_v28 = vrot.slane %v152_v13, 1 }
  0xbc   :  { %v212_v52 = vmul.f32 %v459_v45, %v610_v40  ;;  %479 = vrcp.f32 %v608_v37  ;;  %v286_v25 = vadd.f32 4.0, %v284_v5  ;;  %v256_v60 = vsub.f32 %v610_v40, %v666_v33 }
  0xbd   :  { %v616_v43 = vmul.f32 %v472_v19, %v205_v34  ;;  %481 = vlog2.f32 %v584_v12  ;;  %v243_v19 = vadd.f32 20.0, %v241_v1  ;;  %v222_v24 = vmul.f32 %v220_v4, %v614_v41 }
  0xbe   :  { %v106_v39 = vpop.trf.xlu0  ;;  %v214_v3 = vsub.f32 %v212_v52, %v576_v9  ;;  %v191_v9 = vadd.f32 6.0, %v185_v47  ;;  %v288_v50 = vmul.f32 %v286_v25, %v284_v5  ;;  %v154_v53 = vadd.f32 %v153_v28, %v152_v13 }
  0xbf   :  { %v622_v48 = vsel %vm129_vm0, %v106_v39, 1.0  ;;  %v632_v56 = vmul.f32 %v616_v43, %v616_v43  ;;  %v258_v39 = vmul.f32 0.003968254, %v614_v41  ;;  %v672_v42 = vmul.f32 %v243_v19, %v185_v47 }
  0xc0   :  { %v476_v44 = vpop.eup %475  ;;  %v138_v59 = vsel %vm136_vm1, %v622_v48, 0.0  ;;  %v640_v62 = vadd.f32 6.0, %v622_v48  ;;  %v283_v18 = vadd.f32 5.0, %v622_v48  ;;  %v660_v23 = vadd.f32 0.9189385, %v214_v3 }
  0xc1   :  { %v302_v51 = vmul.f32 %v476_v44, %v601_v27  ;;  %v139_v61 = vadd.f32 %v138_v59, %v137_v57  ;;  %v478_v10 = vpop.eup %477  ;;  %v219_v15 = vmul.f32 0.0005952381, %v632_v56  ;;  %v668_v34 = vmul.f32 %v191_v9, %v189_v16 }
  0xc2   :  { %483 = vrcp.f32 %v640_v62  ;;  %v658_v22 = vpop.eup %479  ;;  %v285_v36 = vmul.f32 %v283_v18, %v622_v48  ;;  %v224_v49 = vsub.f32 0.0027777778, %v222_v24  ;;  %v290_v57 = vadd.f32 6.0, %v284_v5 }
  0xc3   :  { %v304_v58 = vsub.f32 2.0, %v302_v51  ;;  %v140_v7 = vrot.slane %v139_v61, 4  ;;  %485 = vlog2.f32 %v601_v27  ;;  %v221_v32 = vsub.f32 0.0007936508, %v219_v15  ;;  %v482_v38 = vpop.eup %481 }
  0xc4   :  { %487 = vlog2.f32 %v640_v62  ;;  %v287_v59 = vadd.f32 4.0, %v285_v36  ;;  %v272_v1 = vmul.f32 %v658_v22, %v608_v37  ;;  %v226_v4 = vmul.f32 %v224_v49, %v614_v41 }
  0xc5   :  { %v647_v2 = vmul.f32 %v476_v44, %v304_v58  ;;  %v141_v17 = vadd.f32 %v140_v7, %v139_v61  ;;  %v674_v44 = vmul.f32 0.6931472, %v478_v10  ;;  %v223_v54 = vmul.f32 %v221_v32, %v632_v56  ;;  %v158_v32 = vpop.permute.xlu1 %157 }
  0xc6   :  { %v260_v61 = vsub.f32 0.008333334, %v258_v39  ;;  %v292_v7 = vmul.f32 %v290_v57, %v288_v50  ;;  %v461_v5 = vadd.f32 -0.5, %v601_v27  ;;  %v693_v19 = vmul.f32 0.6931472, %v482_v38 }
  0xc7   :  { %v308_v14 = vmul.f32 %v647_v2, %v647_v2  ;;  %v142_v26 = vrot.slane %v141_v17, 2  ;;  %v225_v15 = vsub.f32 0.0027777778, %v223_v54  ;;  %v289_v37 = vmul.f32 %v287_v59, %v285_v36 }
  0xc8   :  { %v484_v46 = vpop.eup %483  ;;  %v262_v24 = vmul.f32 %v260_v61, %v614_v41  ;;  %489 = vlog2.f32 %v668_v34  ;;  %v228_v28 = vsub.f32 0.083333336, %v226_v4  ;;  %v213_v49 = vmul.f32 %v645_v0, %v693_v19 }
  0xc9   :  { %v318_v21 = vmul.f32 0.0005952381, %v308_v14  ;;  %v143_v35 = vadd.f32 %v142_v26, %v141_v17  ;;  %v486_v52 = vpop.eup %485  ;;  %v303_v55 = vmul.f32 %v484_v46, %v640_v62  ;;  %491 = vlog2.f32 %v292_v7 }
  0xca   :  { %v297_v10 = vmul.f32 0.6931472, %v486_v52  ;;  %v488_v18 = vpop.eup %487  ;;  %v264_v54 = vsub.f32 0.083333336, %v262_v24  ;;  %v230_v7 = vmul.f32 %v228_v28, %v603_v30  ;;  %v165_v30 = vmul.f32 %v158_v32, %v594_v20 }
  0xcb   :  { %v320_v31 = vsub.f32 0.0007936508, %v318_v21  ;;  %v144_v51 = vrot.slane %v143_v35, 1  ;;  %v305_v3 = vsub.f32 2.0, %v303_v55  ;;  %v299_v38 = vmul.f32 0.6931472, %v488_v18 }
  0xcc   :  { %v274_v55 = vsub.f32 2.0, %v272_v1  ;;  %v721_v1 = vadd.f32 24.0, %v672_v42 }
  0xcd   :  { %v322_v45 = vmul.f32 %v320_v31, %v308_v14  ;;  %v679_v47 = vadd.f32 %v144_v51, %v143_v35  ;;  %v690_v16 = vmul.f32 %v484_v46, %v305_v3  ;;  %v312_v31 = vmul.f32 %v461_v5, %v297_v10 }
  0xce   :  { %v227_v35 = vmul.f32 %v225_v15, %v632_v56  ;;  %v462_v51 = vadd.f32 -0.5, %v640_v62  ;;  %v259_v5 = vmul.f32 0.003968254, %v632_v56  ;;  %v215_v15 = vsub.f32 %v213_v49, %v584_v12 }
  0xcf   :  { %v324_v58 = vsub.f32 0.0027777778, %v322_v45  ;;  %v687_v13 = vsel %vm340_vm2, %v154_v53, %v679_v47  ;;  %v309_v25 = vmul.f32 %v690_v16, %v690_v16  ;;  %v314_v57 = vsub.f32 %v312_v31, %v601_v27 }
  0xd0   :  { %v342_v17 = vadd.f32 5.0, %v687_v13  ;;  %v696_v21 = vadd.f32 6.0, %v687_v13  ;;  %v229_v59 = vsub.f32 0.083333336, %v227_v35  ;;  %v313_v61 = vmul.f32 %v462_v51, %v299_v38 }
  0xd1   :  { %v326_v9 = vmul.f32 %v324_v58, %v308_v14  ;;  %v291_v14 = vadd.f32 6.0, %v285_v36  ;;  %v319_v39 = vmul.f32 0.0005952381, %v309_v25  ;;  %v490_v58 = vpop.eup %489  ;;  %v726_v18 = vmul.f32 %v658_v22, %v274_v55 }
  0xd2   :  { %v703_v26 = vmul.f32 %v342_v17, %v687_v13  ;;  %493 = vrcp.f32 %v696_v21  ;;  %v492_v4 = vpop.eup %491  ;;  %v315_v24 = vsub.f32 %v313_v61, %v640_v62  ;;  %v232_v31 = vadd.f32 %v230_v7, %v660_v23 }
  0xd3   :  { %v328_v46 = vsub.f32 0.083333336, %v326_v9  ;;  %v293_v50 = vmul.f32 %v291_v14, %v289_v37  ;;  %v321_v52 = vsub.f32 0.0007936508, %v319_v39  ;;  %495 = vrcp.f32 %v668_v34 }
  0xd4   :  { %v344_v45 = vadd.f32 4.0, %v703_v26  ;;  %v346_v36 = vadd.f32 6.0, %v703_v26  ;;  %v316_v9 = vadd.f32 0.9189385, %v314_v57  ;;  %v231_v37 = vmul.f32 %v229_v59, %v616_v43 }
  0xd5   :  { %v323_v0 = vmul.f32 %v321_v52, %v309_v25  ;;  %v330_v10 = vmul.f32 %v328_v46, %v647_v2  ;;  %497 = vlog2.f32 %v293_v50  ;;  %v371_v2 = vmul.f32 3.0, %v703_v26 }
  0xd6   :  { %v345_v53 = vmul.f32 %v344_v45, %v703_v26  ;;  %v735_v14 = vmul.f32 %v264_v54, %v614_v41  ;;  %v261_v35 = vsub.f32 0.008333334, %v259_v5  ;;  %v217_v38 = vadd.f32 0.9189385, %v215_v15  ;;  %v163_v45 = vpop.permute.xlu1 %162 }
  0xd7   :  { %v325_v27 = vsub.f32 0.0027777778, %v323_v0  ;;  %v332_v22 = vadd.f32 %v330_v10, %v316_v9  ;;  %v335_v49 = vmul.f32 0.6931472, %v492_v4  ;;  %v372_v62 = vadd.f32 20.0, %v371_v2 }
  0xd8   :  { %v715_v3 = vmul.f32 %v346_v36, %v345_v53  ;;  %v494_v17 = vpop.eup %493  ;;  %v233_v50 = vadd.f32 %v231_v37, %v217_v38  ;;  %v317_v51 = vadd.f32 0.9189385, %v315_v24  ;;  %v534_v41 = vmov 0.0  }
  0xd9   :  { %v327_v42 = vmul.f32 %v325_v27, %v309_v25  ;;  %v352_v28 = vmul.f32 %v494_v17, %v696_v21  ;;  %v496_v12 = vpop.eup %495  ;;  %54 = vst.msk [vmem:[#allocation2] sm:$0x1] %vm53_vm3, %v534_v41  ;;  %v338_v53 = vsub.f32 %v332_v22, %v335_v49  ;;  %v237_v36 = vmul.f32 0.6931472, %v490_v58 }
  0xda   :  { %499 = vrcp.f32 %v715_v3  ;;  %v263_v54 = vmul.f32 %v261_v35, %v632_v56  ;;  %v166_v55 = vmul.f32 %v163_v45, %v622_v48  ;;  %v238_v4 = vsub.f32 %v232_v31, %v674_v44 }
  0xdb   :  { %v329_v39 = vsub.f32 0.083333336, %v327_v42  ;;  %501 = vlog2.f32 %v696_v21  ;;  %v353_v32 = vsub.f32 2.0, %v352_v28  ;;  %v498_v46 = vpop.eup %497  ;;  %v167_v7 = vsel %vm136_vm1, %v165_v30, 0.0 }
  0xdc   :  { %v337_v59 = vmul.f32 0.6931472, %v498_v46  ;;  %v373_v10 = vmul.f32 %v372_v62, %v703_v26  ;;  %v239_v5 = vsub.f32 %v233_v50, %v237_v36  ;;  %v396_v9 = vsub.f32 %v338_v53, %v238_v4 }
  0xdd   :  { %v331_v23 = vmul.f32 %v329_v39, %v690_v16  ;;  %v739_v52 = vmul.f32 %v494_v17, %v353_v32  ;;  %v273_v16 = vmul.f32 %v496_v12, %v668_v34  ;;  %v265_v2 = vsub.f32 0.083333336, %v263_v54 }
  0xde   :  { %v375_v37 = vmul.f32 2.0, %v687_v13  ;;  %v168_v24 = vsel %vm136_vm1, %v166_v55, 0.0  ;;  %v255_v30 = vmul.f32 0.5, %v616_v43  ;;  %v374_v26 = vadd.f32 24.0, %v373_v10 }
  0xdf   :  { %v333_v57 = vadd.f32 %v331_v23, %v317_v51  ;;  %v355_v61 = vmul.f32 %v739_v52, %v739_v52  ;;  %v275_v44 = vsub.f32 2.0, %v273_v16  ;;  %v378_v35 = vmul.f32 0.5, %v739_v52 }
  0xe0   :  { %v500_v25 = vpop.eup %499  ;;  %v267_v45 = vmul.f32 %v265_v2, %v632_v56  ;;  %v463_v13 = vadd.f32 -0.5, %v696_v21  ;;  %v376_v46 = vadd.f32 5.0, %v375_v37  ;;  %v169_v49 = vadd.f32 %v168_v24, %v167_v7 }
  0xe1   :  { %v387_v0 = vmul.f32 %v500_v25, %v715_v3  ;;  %v502_v58 = vpop.eup %501  ;;  %v339_v15 = vsub.f32 %v333_v57, %v337_v59  ;;  %v380_v27 = vmul.f32 0.003968254, %v355_v61  ;;  %v360_v17 = vmul.f32 0.0005952381, %v355_v61 }
  0xe2   :  { %v350_v31 = vmul.f32 0.6931472, %v502_v58  ;;  %v398_v62 = vsel %vm136_vm1, %v396_v9, 0.0  ;;  %v277_v43 = vmul.f32 %v496_v12, %v275_v44  ;;  %v257_v41 = vsub.f32 %v693_v19, %v255_v30 }
  0xe3   :  { %v381_v42 = vsub.f32 0.008333334, %v380_v27  ;;  %v388_v28 = vsub.f32 2.0, %v387_v0  ;;  %v397_v34 = vsub.f32 %v339_v15, %v239_v5  ;;  %v361_v22 = vsub.f32 0.0007936508, %v360_v17 }
  0xe4   :  { %v357_v53 = vmul.f32 %v463_v13, %v350_v31  ;;  %v377_v54 = vmul.f32 %v376_v46, %v374_v26  ;;  %v379_v55 = vsub.f32 %v350_v31, %v378_v35  ;;  %v268_v56 = vsub.f32 %v256_v60, %v735_v14 }
  0xe5   :  { %v382_v38 = vmul.f32 %v381_v42, %v355_v61  ;;  %v399_v39 = vsel %vm136_vm1, %v397_v34, 0.0  ;;  %v362_v32 = vmul.f32 %v361_v22, %v355_v61  ;;  %v389_v51 = vmul.f32 %v500_v25, %v388_v28 }
  0xe6   :  { %v400_v36 = vadd.f32 %v399_v39, %v398_v62  ;;  %v253_v0 = vmul.f32 %v663_v29, %v721_v1  ;;  %v269_v16 = vsub.f32 %v257_v41, %v267_v45  ;;  %v170_v25 = vrot.slane %v169_v49, 4 }
  0xe7   :  { %v383_v50 = vsub.f32 0.083333336, %v382_v38  ;;  %v363_v23 = vsub.f32 0.0027777778, %v362_v32  ;;  %v390_v12 = vmul.f32 %v389_v51, %v377_v54  ;;  %503 = vlog2.f32 %v715_v3 }
  0xe8   :  { %v358_v19 = vsub.f32 %v357_v53, %v696_v21  ;;  %v401_v10 = vrot.slane %v400_v36, 4  ;;  %v279_v58 = vmul.f32 %v277_v43, %v253_v0  ;;  %v171_v40 = vadd.f32 %v170_v25, %v169_v49  ;;  %v425_v53 = vld [vmem:[#allocation2] sm:$0x1] }
  0xe9   :  { %v384_v57 = vmul.f32 %v383_v50, %v355_v61  ;;  %v364_v59 = vmul.f32 %v363_v23, %v355_v61  ;;  %v278_v61 = vmul.f32 %v726_v18, %v642_v63  ;;  %505 = vrcp.f32 %v679_v47 }
  0xea   :  { %v281_v29 = vsub.f32 %v269_v16, %v279_v58  ;;  %v359_v14 = vadd.f32 0.9189385, %v358_v19  ;;  %v402_v15 = vadd.f32 %v401_v10, %v400_v36  ;;  %v408_v21 = vsub.f32 %v573_v8, %v594_v20 }
  0xeb   :  { %v385_v4 = vsub.f32 %v379_v55, %v384_v57  ;;  %v365_v7 = vsub.f32 0.083333336, %v364_v59  ;;  %v280_v60 = vsub.f32 %v268_v56, %v278_v61  ;;  %v409_v3 = vsub.f32 %v580_v11, %v622_v48 }
  0xec   :  { %v172_v17 = vrot.slane %v171_v40, 2  ;;  %v403_v24 = vrot.slane %v402_v15, 2 }
  0xed   :  { %v391_v5 = vsub.f32 %v385_v4, %v390_v12  ;;  %v366_v33 = vmul.f32 %v365_v7, %v739_v52  ;;  %v504_v27 = vpop.eup %503 }
  0xee   :  { %v369_v37 = vmul.f32 0.6931472, %v504_v27  ;;  %v173_v44 = vadd.f32 %v172_v17, %v171_v40  ;;  %v404_v11 = vadd.f32 %v403_v24, %v402_v15 }
  0xef   :  { %v410_v1 = vperm.slane %v391_v5, 0  ;;  %v367_v9 = vadd.f32 %v366_v33, %v359_v14  ;;  %v506_v42 = vpop.eup %505 }
  0xf0   :  { %v178_v20 = vmul.f32 %v506_v42, %v679_v47  ;;  %v174_v31 = vrot.slane %v173_v44, 1  ;;  %v405_v39 = vrot.slane %v404_v11, 1 }
  0xf1   :  { %v411_v63 = vsub.f32 %v280_v60, %v410_v1  ;;  %v412_v18 = vsub.f32 %v281_v29, %v410_v1  ;;  %v370_v30 = vsub.f32 %v367_v9, %v369_v37 }
  0xf2   :  { %v179_v38 = vsub.f32 2.0, %v178_v20  ;;  %v175_v32 = vadd.f32 %v174_v31, %v173_v44  ;;  %v406_v49 = vadd.f32 %v405_v39, %v404_v11 }
  0xf3   :  { %v413_v2 = vmul.f32 %v411_v63, %v408_v21  ;;  %v414_v52 = vmul.f32 %v412_v18, %v409_v3  ;;  %v393_v26 = vrot.slane %v370_v30, 1 }
  0xf4   :  { %v180_v46 = vmul.f32 %v506_v42, %v179_v38  ;;  %v176_v50 = vmul.f32 16.0, %v175_v32 }
  0xf5   :  { %v415_v28 = vsel %vm136_vm1, %v413_v2, 0.0  ;;  %v416_v34 = vsel %vm136_vm1, %v414_v52, 0.0  ;;  %v395_v45 = vsub.f32 %v370_v30, %v393_v26 }
  0xf6   :  { %v417_v22 = vadd.f32 %v416_v34, %v415_v28  ;;  %v181_v43 = vmul.f32 %v180_v46, %v176_v50 }
  0xf7   :  { %v407_v51 = vadd.f32 %v406_v49, %v395_v45 }
  0xf8   :  { %v418_v8 = vrot.slane %v417_v22, 4 }
  0xfa   :  { %v419_v48 = vadd.f32 %v418_v8, %v417_v22 }
  0xfc   :  { %v420_v35 = vrot.slane %v419_v48, 2 }
  0xfe   :  { %v421_v13 = vadd.f32 %v420_v35, %v419_v48 }
 0x100   :  { %v422_v62 = vrot.slane %v421_v13, 1 }
 0x102   :  { %v423_v23 = vadd.f32 %v422_v62, %v421_v13 }
 0x104   :  { %v424_v41 = vadd.f32 %v423_v23, %v407_v51 }
 0x106   :  { %v426_v47 = vmul.f32 %v424_v41, %v181_v43 }
 0x108   :  { %v427_v36 = vsel %vm129_vm0, %v426_v47, 0.0 }
 0x109   :  { %v428_v54 = vadd.f32 %v427_v36, %v425_v53 }
 0x10b   :  { %430 = vst.msk [vmem:[#allocation2] sm:$0x1] %vm53_vm3, %v428_v54 }
 0x10c   :  { %441 = dma.vmem_to_hbm [thread:$0]  %s437_s1, 16, %s439_s21, [#allocation3]  }
 0x10d   :  { %531 = dma.done.wait [#allocation3], 16  }
 0x10e   :  { %532 = vsyncadd [#allocation3], 4294967280 }
 0x10f   :  { %446 = vsyncpa [#allocation3], 1 }

// kernel: tpu_custom_call.1
= control target key start
LH: loop header
LB: loop body
LE: loop exit
PB: predicated region body
PF: predicated region fallthrough
CT: control target
= control target key end

     0   :  { %s729_s0 = inlined_call_operand.vmem [shape: f32[16,8], index: 0, kind: input, shape index: {}]   ;;  %s730_s1 = inlined_call_operand.vmem [shape: f32[16,8], index: 1, kind: input, shape index: {}]   ;;  %s731_s2 = inlined_call_operand.vmem [shape: f32[16,1], index: 2, kind: input, shape index: {}]   ;;  %s732_s3 = inlined_call_operand.hbm [shape: f32[1,8], index: 3, kind: output, shape index: {}]  }
   0x1   :  { %v59_v0 = vld [vmem:[%s731_s2] sm:$0xff] }
   0x2   :  { %8 = vsyncpa [#allocation3], 0  ;;  %v470_v1 = vmov 0   ;;  %v60_v2 = vld [vmem:[%s731_s2 + $0x8] sm:$0xff]  ;;  %v63_v3 = vlaneseq  ;;  %vm74_vm1 = vcmask 64512   ;;  %v55_v5 = vld [vmem:[%s729_s0] sm:$0xff] }
   0x3   :  { %405 = vset.pattern.permute.xlu0 %v470_v1  ;;  %v56_v6 = vld [vmem:[%s729_s0 + $0x8] sm:$0xff]  ;;  %v57_v7 = vld [vmem:[%s730_s1] sm:$0xff]  ;;  %vm278_vm2 = vcmask 1040384   ;;  %vm53_vm3 = vcmask 57344   ;;  %s472_s0 = smov [#allocation2]   ;;  %s376_s25 = sshll.u32 %s732_s3, 4  ;;  %s377_s25 = int_to_ptr.hbm [resolvable:$true] %s376_s25 }
   0x4   :  { %95 = vperm.xlu0 %405, %v59_v0   ;;  %v499_v4 = vand.u32 127, %v63_v3  ;;  %v58_v11 = vld [vmem:[%s730_s1 + $0x8] sm:$0xff]  ;;  %s374_s1 = sshll.u32 %s472_s0, 4  ;;  %s375_s1 = int_to_ptr.vmem [resolvable:$true] %s374_s1 }
   0x6   :  { %vm67_vm0 = vcmp.lt.s32.totalorder %v499_v4, 8 }
   0x7   :  { %v513_v8 = vsel %vm67_vm0, %v55_v5, 1.0  ;;  %v517_v9 = vsel %vm67_vm0, %v56_v6, 1.0  ;;  %v521_v10 = vsel %vm67_vm0, %v57_v7, 1.0  ;;  %v534_v15 = vsel %vm67_vm0, %v58_v11, 1.0 }
   0x8   :  { %v75_v12 = vsel %vm74_vm1, %v521_v10, 0.0  ;;  %v84_v13 = vsel %vm74_vm1, %v513_v8, 0.0  ;;  %v85_v14 = vsel %vm74_vm1, %v517_v9, 0.0  ;;  %v76_v17 = vsel %vm74_vm1, %v534_v15, 0.0 }
   0x9   :  { %v86_v16 = vadd.f32 %v85_v14, %v84_v13  ;;  %v77_v18 = vadd.f32 %v76_v17, %v75_v12  ;;  %v539_v30 = vadd.f32 6.0, %v513_v8  ;;  %v542_v31 = vadd.f32 6.0, %v517_v9 }
   0xa   :  { %v545_v32 = vadd.f32 6.0, %v521_v10  ;;  %v550_v34 = vadd.f32 6.0, %v534_v15  ;;  %v121_v39 = vadd.f32 5.0, %v517_v9  ;;  %v120_v46 = vadd.f32 5.0, %v513_v8 }
   0xb   :  { %v87_v19 = vrot.slane %v86_v16, 4  ;;  %v78_v20 = vrot.slane %v77_v18, 4  ;;  %406 = vrcp.f32 %v539_v30  ;;  %v220_v54 = vadd.f32 5.0, %v521_v10 }
   0xc   :  { %100 = vperm.xlu0 %405, %v60_v2   ;;  %408 = vrcp.f32 %v545_v32  ;;  %v123_v43 = vmul.f32 %v121_v39, %v517_v9  ;;  %v582_v58 = vmul.f32 %v120_v46, %v513_v8  ;;  %v221_v60 = vadd.f32 5.0, %v534_v15 }
   0xd   :  { %v88_v21 = vadd.f32 %v87_v19, %v86_v16  ;;  %v79_v22 = vadd.f32 %v78_v20, %v77_v18  ;;  %410 = vrcp.f32 %v542_v31  ;;  %v222_v62 = vmul.f32 %v220_v54, %v521_v10 }
   0xe   :  { %412 = vrcp.f32 %v550_v34  ;;  %v125_v49 = vadd.f32 4.0, %v123_v43  ;;  %v129_v56 = vadd.f32 6.0, %v123_v43  ;;  %v223_v5 = vmul.f32 %v221_v60, %v534_v15 }
   0xf   :  { %v89_v23 = vrot.slane %v88_v21, 2  ;;  %v80_v24 = vrot.slane %v79_v22, 2  ;;  %v224_v3 = vadd.f32 4.0, %v222_v62  ;;  %v124_v12 = vadd.f32 4.0, %v582_v58 }
  0x10   :  { %v127_v55 = vmul.f32 %v125_v49, %v123_v43  ;;  %v228_v16 = vadd.f32 6.0, %v222_v62  ;;  %v179_v17 = vmul.f32 3.0, %v123_v43  ;;  %v229_v39 = vadd.f32 6.0, %v223_v5 }
  0x11   :  { %v90_v25 = vadd.f32 %v89_v23, %v88_v21  ;;  %v81_v26 = vadd.f32 %v80_v24, %v79_v22  ;;  %v563_v38 = vpop.eup %406  ;;  %v226_v14 = vmul.f32 %v224_v3, %v222_v62  ;;  %v225_v21 = vadd.f32 4.0, %v223_v5 }
  0x12   :  { %v409_v41 = vpop.eup %408  ;;  %v577_v52 = vmul.f32 %v563_v38, %v539_v30  ;;  %v590_v63 = vmul.f32 %v129_v56, %v127_v55  ;;  %v398_v54 = vadd.f32 -0.5, %v542_v31 }
  0x13   :  { %v91_v27 = vrot.slane %v90_v25, 1  ;;  %v82_v28 = vrot.slane %v81_v26, 1  ;;  %v411_v42 = vpop.eup %410  ;;  %v240_v44 = vmul.f32 %v409_v41, %v545_v32 }
  0x14   :  { %v413_v45 = vpop.eup %412  ;;  %v141_v47 = vmul.f32 %v411_v42, %v542_v31  ;;  %v142_v13 = vsub.f32 2.0, %v577_v52 }
  0x15   :  { %v92_v29 = vadd.f32 %v91_v27, %v90_v25  ;;  %v547_v33 = vadd.f32 %v82_v28, %v81_v26  ;;  %v242_v50 = vsub.f32 2.0, %v240_v44  ;;  %v241_v57 = vmul.f32 %v413_v45, %v550_v34 }
  0x16   :  { %v143_v51 = vsub.f32 2.0, %v141_v47  ;;  %v399_v26 = vadd.f32 -0.5, %v545_v32  ;;  %v181_v27 = vadd.f32 20.0, %v179_v17 }
  0x17   :  { %v555_v35 = vsel %vm278_vm2, %v92_v29, %v547_v33  ;;  %v593_v1 = vmul.f32 %v409_v41, %v242_v50  ;;  %v243_v6 = vsub.f32 2.0, %v241_v57  ;;  %v126_v41 = vmul.f32 %v124_v12, %v582_v58 }
  0x18   :  { %v559_v36 = vadd.f32 6.0, %v555_v35  ;;  %v280_v37 = vadd.f32 5.0, %v555_v35  ;;  %v584_v59 = vmul.f32 %v411_v42, %v143_v51  ;;  %v230_v42 = vmul.f32 %v228_v16, %v226_v14 }
  0x19   :  { %v611_v20 = vmul.f32 %v593_v1, %v593_v1  ;;  %v613_v22 = vmul.f32 %v413_v45, %v243_v6  ;;  %v183_v44 = vmul.f32 %v181_v27, %v123_v43  ;;  %v187_v45 = vmul.f32 2.0, %v517_v9 }
  0x1a   :  { %v567_v40 = vmul.f32 %v280_v37, %v555_v35  ;;  %414 = vrcp.f32 %v559_v36  ;;  %v601_v7 = vmul.f32 %v584_v59, %v584_v59  ;;  %v227_v50 = vmul.f32 %v225_v21, %v223_v5 }
  0x1b   :  { %416 = vlog2.f32 %v545_v32  ;;  %v185_v57 = vadd.f32 24.0, %v183_v44  ;;  %v189_v60 = vadd.f32 5.0, %v187_v45  ;;  %v193_v43 = vmul.f32 0.5, %v584_v59 }
  0x1c   :  { %v282_v48 = vadd.f32 4.0, %v567_v40  ;;  %v284_v0 = vadd.f32 6.0, %v567_v40  ;;  %418 = vlog2.f32 %v542_v31  ;;  %v197_v18 = vmul.f32 0.003968254, %v601_v7 }
  0x1d   :  { %420 = vrcp.f32 %v590_v63  ;;  %v309_v28 = vmul.f32 3.0, %v567_v40  ;;  %v186_v5 = vmul.f32 2.0, %v513_v8  ;;  %v400_v12 = vadd.f32 -0.5, %v550_v34 }
  0x1e   :  { %v283_v61 = vmul.f32 %v282_v48, %v567_v40  ;;  %422 = vlog2.f32 %v550_v34  ;;  %v199_v37 = vsub.f32 0.008333334, %v197_v18  ;;  %v231_v17 = vmul.f32 %v229_v39, %v227_v50 }
  0x1f   :  { %v310_v56 = vadd.f32 20.0, %v309_v28  ;;  %v191_v21 = vmul.f32 %v189_v60, %v185_v57 }
  0x20   :  { %v415_v53 = vpop.eup %414  ;;  %v604_v11 = vmul.f32 %v284_v0, %v283_v61  ;;  %v201_v48 = vmul.f32 %v199_v37, %v601_v7  ;;  %v629_v0 = vmul.f32 %v613_v22, %v613_v22  ;;  %v646_v37 = vadd.f32 5.0, %v186_v5 }
  0x21   :  { %v290_v2 = vmul.f32 %v415_v53, %v559_v36  ;;  %v417_v19 = vpop.eup %416 }
  0x22   :  { %v419_v24 = vpop.eup %418  ;;  %v235_v25 = vmul.f32 0.6931472, %v417_v19  ;;  %424 = vrcp.f32 %v604_v11  ;;  %v203_v61 = vsub.f32 0.083333336, %v201_v48  ;;  %v311_v19 = vmul.f32 %v310_v56, %v567_v40 }
  0x23   :  { %v291_v23 = vsub.f32 2.0, %v290_v2  ;;  %v421_v29 = vpop.eup %420  ;;  %426 = vlog2.f32 %v559_v36  ;;  %v137_v51 = vmul.f32 0.6931472, %v419_v24  ;;  %v128_v2 = vadd.f32 6.0, %v582_v58 }
  0x24   :  { %v423_v46 = vpop.eup %422  ;;  %v250_v47 = vmul.f32 %v399_v26, %v235_v25  ;;  %v211_v49 = vmul.f32 %v421_v29, %v590_v63  ;;  %428 = vlog2.f32 %v230_v42  ;;  %v205_v24 = vmul.f32 %v203_v61, %v601_v7 }
  0x25   :  { %v624_v55 = vmul.f32 %v415_v53, %v291_v23  ;;  %v237_v6 = vmul.f32 0.6931472, %v423_v46  ;;  %v635_v16 = vmul.f32 %v398_v54, %v137_v51  ;;  %v195_v23 = vsub.f32 %v137_v51, %v193_v43 }
  0x26   :  { %v213_v62 = vsub.f32 2.0, %v211_v49  ;;  %v252_v53 = vsub.f32 %v250_v47, %v545_v32  ;;  %v313_v25 = vmul.f32 2.0, %v555_v35  ;;  %v312_v26 = vadd.f32 24.0, %v311_v19 }
  0x27   :  { %v639_v18 = vmul.f32 %v624_v55, %v624_v55  ;;  %v650_v42 = vmul.f32 %v400_v12, %v237_v6  ;;  %v316_v46 = vmul.f32 0.5, %v624_v55  ;;  %v346_v47 = vsub.f32 %v513_v8, %v521_v10 }
  0x28   :  { %v425_v3 = vpop.eup %424  ;;  %v215_v32 = vmul.f32 %v421_v29, %v213_v62  ;;  %v648_v39 = vadd.f32 0.9189385, %v252_v53  ;;  %v314_v44 = vadd.f32 5.0, %v313_v25  ;;  %v207_v48 = vsub.f32 %v195_v23, %v205_v24 }
  0x29   :  { %v427_v14 = vpop.eup %426  ;;  %v318_v27 = vmul.f32 0.003968254, %v639_v18  ;;  %v325_v28 = vmul.f32 %v425_v3, %v604_v11  ;;  %430 = vlog2.f32 %v539_v30  ;;  %v663_v49 = vmul.f32 %v563_v38, %v142_v13 }
  0x2a   :  { %v652_v40 = vpop.eup %428  ;;  %v654_v45 = vmul.f32 0.6931472, %v427_v14  ;;  %v217_v50 = vmul.f32 %v215_v32, %v191_v21  ;;  %v315_v51 = vmul.f32 %v314_v44, %v312_v26  ;;  %v130_v57 = vmul.f32 %v128_v2, %v126_v41 }
  0x2b   :  { %v319_v35 = vsub.f32 0.008333334, %v318_v27  ;;  %v326_v29 = vsub.f32 2.0, %v325_v28  ;;  %v146_v60 = vmul.f32 %v663_v49, %v663_v49  ;;  %v157_v43 = vmul.f32 0.0005952381, %v601_v7 }
  0x2c   :  { %v178_v61 = vmul.f32 3.0, %v582_v58  ;;  %v253_v62 = vsub.f32 %v650_v42, %v550_v34  ;;  %432 = vlog2.f32 %v231_v17  ;;  %v317_v38 = vsub.f32 %v654_v45, %v316_v46 }
  0x2d   :  { %v320_v54 = vmul.f32 %v319_v35, %v639_v18  ;;  %v327_v56 = vmul.f32 %v425_v3, %v326_v29  ;;  %v397_v13 = vadd.f32 -0.5, %v539_v30  ;;  %v156_v5 = vmul.f32 0.0005952381, %v146_v60 }
  0x2e   :  { %v159_v53 = vsub.f32 0.0007936508, %v157_v43  ;;  %v180_v3 = vadd.f32 20.0, %v178_v61  ;;  %v196_v6 = vmul.f32 0.003968254, %v146_v60  ;;  %v219_v19 = vsub.f32 %v207_v48, %v217_v50 }
  0x2f   :  { %v321_v52 = vsub.f32 0.083333336, %v320_v54  ;;  %v328_v2 = vmul.f32 %v327_v56, %v315_v51  ;;  %v256_v12 = vmul.f32 0.0005952381, %v611_v20  ;;  %v431_v14 = vpop.eup %430  ;;  %v158_v21 = vsub.f32 0.0007936508, %v156_v5 }
  0x30   :  { %v161_v23 = vmul.f32 %v159_v53, %v601_v7  ;;  %434 = vrcp.f32 %v130_v57  ;;  %v135_v24 = vmul.f32 0.6931472, %v431_v14  ;;  %v182_v25 = vmul.f32 %v180_v3, %v582_v58 }
  0x31   :  { %v322_v41 = vmul.f32 %v321_v52, %v639_v18  ;;  %v198_v32 = vsub.f32 0.008333334, %v196_v6  ;;  %v160_v26 = vmul.f32 %v158_v21, %v146_v60  ;;  %v257_v28 = vmul.f32 0.0005952381, %v629_v0 }
  0x32   :  { %v163_v27 = vsub.f32 0.0027777778, %v161_v23  ;;  %v258_v44 = vsub.f32 0.0007936508, %v256_v12  ;;  %v433_v46 = vpop.eup %432  ;;  %v347_v29 = vsub.f32 %v517_v9, %v534_v15  ;;  %v150_v48 = vmul.f32 %v397_v13, %v135_v24 }
  0x33   :  { %v323_v17 = vsub.f32 %v317_v38, %v322_v41  ;;  %v192_v50 = vmul.f32 0.5, %v663_v49  ;;  %v153_v51 = vsub.f32 %v635_v16, %v542_v31  ;;  %v162_v54 = vsub.f32 0.0027777778, %v160_v26 }
  0x34   :  { %v165_v58 = vmul.f32 %v163_v27, %v601_v7  ;;  %436 = vlog2.f32 %v130_v57  ;;  %v184_v43 = vadd.f32 24.0, %v182_v25  ;;  %v200_v61 = vmul.f32 %v198_v32, %v146_v60 }
  0x35   :  { %v329_v35 = vsub.f32 %v323_v17, %v328_v2  ;;  %438 = vlog2.f32 %v590_v63  ;;  %v152_v52 = vsub.f32 %v150_v48, %v539_v30  ;;  %v164_v5 = vmul.f32 %v162_v54, %v146_v60 }
  0x36   :  { %v435_v38 = vpop.eup %434  ;;  %v259_v9 = vsub.f32 0.0007936508, %v257_v28  ;;  %v260_v13 = vmul.f32 %v258_v44, %v611_v20  ;;  %v167_v53 = vsub.f32 0.083333336, %v165_v58  ;;  %v194_v3 = vsub.f32 %v135_v24, %v192_v50 }
  0x37   :  { %v348_v56 = vperm.slane %v329_v35, 0  ;;  %v202_v41 = vsub.f32 0.083333336, %v200_v61  ;;  %v210_v31 = vmul.f32 %v435_v38, %v130_v57  ;;  %v155_v16 = vadd.f32 0.9189385, %v153_v51 }
  0x38   :  { %v166_v7 = vsub.f32 0.083333336, %v164_v5  ;;  %v471_v6 = vmov 0.0   ;;  %v190_v63 = vmul.f32 %v646_v37, %v184_v43  ;;  %v154_v21 = vadd.f32 0.9189385, %v152_v52 }
  0x39   :  { %v350_v2 = vsub.f32 %v219_v19, %v348_v56  ;;  %54 = vst.msk [vmem:[#allocation2] sm:$0x1] %vm53_vm3, %v471_v6  ;;  %v204_v12 = vmul.f32 %v202_v41, %v146_v60  ;;  %v212_v14 = vsub.f32 2.0, %v210_v31  ;;  %v261_v17 = vmul.f32 %v259_v9, %v629_v0 }
  0x3a   :  { %v437_v30 = vpop.eup %436  ;;  %v168_v23 = vmul.f32 %v166_v7, %v663_v49  ;;  %v262_v24 = vsub.f32 0.0027777778, %v260_v13  ;;  %v169_v57 = vmul.f32 %v167_v53, %v584_v59  ;;  %v401_v19 = vadd.f32 -0.5, %v559_v36 }
  0x3b   :  { %v439_v25 = vpop.eup %438  ;;  %v206_v32 = vsub.f32 %v194_v3, %v204_v12  ;;  %v214_v26 = vmul.f32 %v435_v38, %v212_v14  ;;  %v273_v27 = vmul.f32 0.6931472, %v652_v40  ;;  %v263_v28 = vsub.f32 0.0027777778, %v261_v17 }
  0x3c   :  { %v264_v37 = vmul.f32 %v262_v24, %v611_v20  ;;  %v298_v60 = vmul.f32 0.0005952381, %v639_v18  ;;  %v255_v49 = vadd.f32 0.9189385, %v253_v62  ;;  %v173_v44 = vmul.f32 0.6931472, %v437_v30 }
  0x3d   :  { %v216_v35 = vmul.f32 %v214_v26, %v190_v63  ;;  %v295_v48 = vmul.f32 %v401_v19, %v654_v45  ;;  %v170_v59 = vadd.f32 %v168_v23, %v154_v21  ;;  %v265_v50 = vmul.f32 %v263_v28, %v629_v0 }
  0x3e   :  { %v266_v51 = vsub.f32 0.083333336, %v264_v37  ;;  %v299_v54 = vsub.f32 0.0007936508, %v298_v60  ;;  %v352_v58 = vmul.f32 %v350_v2, %v347_v29  ;;  %v171_v40 = vadd.f32 %v169_v57, %v155_v16 }
  0x3f   :  { %v175_v43 = vmul.f32 0.6931472, %v439_v25  ;;  %v218_v61 = vsub.f32 %v206_v32, %v216_v35  ;;  %v267_v38 = vsub.f32 0.083333336, %v265_v50  ;;  %440 = vlog2.f32 %v604_v11 }
  0x40   :  { %v268_v52 = vmul.f32 %v266_v51, %v593_v1  ;;  %v300_v34 = vmul.f32 %v299_v54, %v639_v18  ;;  %v275_v42 = vmul.f32 0.6931472, %v433_v46  ;;  %v296_v45 = vsub.f32 %v295_v48, %v559_v36 }
  0x41   :  { %v349_v62 = vsub.f32 %v218_v61, %v348_v56  ;;  %v176_v5 = vsub.f32 %v170_v59, %v173_v44  ;;  %v269_v0 = vmul.f32 %v267_v38, %v613_v22  ;;  %v354_v1 = vsel %vm74_vm1, %v352_v58, 0.0 }
  0x42   :  { %v270_v29 = vadd.f32 %v268_v52, %v648_v39  ;;  %v301_v9 = vsub.f32 0.0027777778, %v300_v34  ;;  %v177_v53 = vsub.f32 %v171_v40, %v175_v43  ;;  %v297_v46 = vadd.f32 0.9189385, %v296_v45 }
  0x43   :  { %v351_v13 = vmul.f32 %v349_v62, %v346_v47  ;;  %v271_v3 = vadd.f32 %v269_v0, %v255_v49  ;;  %442 = vrcp.f32 %v547_v33 }
  0x44   :  { %v276_v41 = vsub.f32 %v270_v29, %v273_v27  ;;  %v302_v11 = vmul.f32 %v301_v9, %v639_v18 }
  0x45   :  { %v353_v36 = vsel %vm74_vm1, %v351_v13, 0.0  ;;  %v441_v56 = vpop.eup %440  ;;  %v277_v31 = vsub.f32 %v271_v3, %v275_v42  ;;  %v363_v42 = vld [vmem:[#allocation2] sm:$0x1] }
  0x46   :  { %v303_v22 = vsub.f32 0.083333336, %v302_v11  ;;  %v334_v16 = vsub.f32 %v276_v41, %v176_v5  ;;  %v355_v39 = vadd.f32 %v354_v1, %v353_v36  ;;  %v307_v12 = vmul.f32 0.6931472, %v441_v56 }
  0x47   :  { %v335_v2 = vsub.f32 %v277_v31, %v177_v53 }
  0x48   :  { %v304_v47 = vmul.f32 %v303_v22, %v624_v55  ;;  %v336_v6 = vsel %vm74_vm1, %v334_v16, 0.0  ;;  %v356_v63 = vrot.slane %v355_v39, 4 }
  0x49   :  { %v337_v30 = vsel %vm74_vm1, %v335_v2, 0.0  ;;  %v443_v57 = vpop.eup %442 }
  0x4a   :  { %v305_v14 = vadd.f32 %v304_v47, %v297_v46  ;;  %v357_v21 = vadd.f32 %v356_v63, %v355_v39  ;;  %v338_v17 = vadd.f32 %v337_v30, %v336_v6 }
  0x4c   :  { %v358_v25 = vrot.slane %v357_v21, 2  ;;  %v308_v55 = vsub.f32 %v305_v14, %v307_v12  ;;  %v339_v32 = vrot.slane %v338_v17, 4 }
  0x4e   :  { %v340_v19 = vadd.f32 %v339_v32, %v338_v17  ;;  %v359_v27 = vadd.f32 %v358_v25, %v357_v21  ;;  %v331_v37 = vrot.slane %v308_v55, 1 }
  0x50   :  { %v341_v60 = vrot.slane %v340_v19, 2  ;;  %v360_v35 = vrot.slane %v359_v27, 1  ;;  %v333_v50 = vsub.f32 %v308_v55, %v331_v37 }
  0x52   :  { %v342_v44 = vadd.f32 %v341_v60, %v340_v19  ;;  %v361_v40 = vadd.f32 %v360_v35, %v359_v27 }
  0x54   :  { %v343_v51 = vrot.slane %v342_v44, 1 }
  0x56   :  { %v344_v58 = vadd.f32 %v343_v51, %v342_v44 }
  0x76   :  { %v96_v20 = vpop.permute.xlu0 %95 }
  0x77   :  { %v103_v7 = vmul.f32 %v96_v20, %v521_v10  ;;  %v345_v20 = vadd.f32 %v344_v58, %v333_v50 }
  0x79   :  { %v105_v23 = vsel %vm74_vm1, %v103_v7, 0.0  ;;  %v362_v52 = vadd.f32 %v361_v40, %v345_v20 }
  0x7e   :  { %v101_v8 = vpop.permute.xlu0 %100 }
  0x7f   :  { %v104_v18 = vmul.f32 %v101_v8, %v534_v15  ;;  %v116_v15 = vmul.f32 %v443_v57, %v547_v33 }
  0x81   :  { %v106_v10 = vsel %vm74_vm1, %v104_v18, 0.0  ;;  %v117_v59 = vsub.f32 2.0, %v116_v15 }
  0x82   :  { %v107_v24 = vadd.f32 %v106_v10, %v105_v23 }
  0x83   :  { %v118_v61 = vmul.f32 %v443_v57, %v117_v59 }
  0x84   :  { %v108_v26 = vrot.slane %v107_v24, 4 }
  0x86   :  { %v109_v28 = vadd.f32 %v108_v26, %v107_v24 }
  0x88   :  { %v110_v49 = vrot.slane %v109_v28, 2 }
  0x8a   :  { %v111_v48 = vadd.f32 %v110_v49, %v109_v28 }
  0x8c   :  { %v112_v54 = vrot.slane %v111_v48, 1 }
  0x8e   :  { %v113_v43 = vadd.f32 %v112_v54, %v111_v48 }
  0x90   :  { %v114_v38 = vmul.f32 16.0, %v113_v43 }
  0x92   :  { %v119_v34 = vmul.f32 %v118_v61, %v114_v38 }
  0x94   :  { %v364_v33 = vmul.f32 %v362_v52, %v119_v34 }
  0x96   :  { %v365_v45 = vsel %vm67_vm0, %v364_v33, 0.0 }
  0x97   :  { %v366_v62 = vadd.f32 %v365_v45, %v363_v42 }
  0x99   :  { %368 = vst.msk [vmem:[#allocation2] sm:$0x1] %vm53_vm3, %v366_v62 }
  0x9a   :  { %379 = dma.vmem_to_hbm [thread:$0]  %s375_s1, 16, %s377_s25, [#allocation3]  }
  0x9b   :  { %468 = dma.done.wait [#allocation3], 16  }
  0x9c   :  { %469 = vsyncadd [#allocation3], 4294967280 }
  0x9d   :  { %384 = vsyncpa [#allocation3], 1 }

</bundles_post_ra>
